<compile_context>
chip_gen: v6e
topology: v6e:2x2x1
jax: 0.10.0
libtpu: 0.0.40
codegen_flags: <defaults>
</compile_context>

<pallas_src>
import jax
import jax.numpy as jnp
from jax.experimental import pallas as pl
from jax.experimental.pallas import tpu as pltpu

SEQ_LEN = 50   # fixed by the module: linear1 in_features = embedding_dim * 50 * 2


def _round_up(x, m):
    return (x + m - 1) // m * m


def _mlp_kernel(x_ref, w1_ref, b1_ref, w2_ref, b2_ref,
                w3_ref, b3_ref, w4_ref, b4_ref, o_ref):
    # linear1 + ReLU   (bf16 MXU matmul, f32 accumulate, f32 bias/ReLU)
    h = jnp.dot(x_ref[...], w1_ref[...], preferred_element_type=jnp.float32)
    h = jnp.maximum(h + b1_ref[...], 0.0)
    # hidden: 512 -> 256 + ReLU (+ Dropout = identity in eval)
    h = jnp.dot(h.astype(jnp.bfloat16), w2_ref[...],
                preferred_element_type=jnp.float32)
    h = jnp.maximum(h + b2_ref[...], 0.0)
    # hidden: 256 -> 128 + ReLU (+ Dropout = identity in eval)
    h = jnp.dot(h.astype(jnp.bfloat16), w3_ref[...],
                preferred_element_type=jnp.float32)
    h = jnp.maximum(h + b3_ref[...], 0.0)
    # linear2 (128 -> 1) emitted lane-dense: (1,128) contracted against
    # (tm,128) on the 128 axis -> (1, tm) row of logits (unmasked stores).
    logits = jax.lax.dot_general(
        w4_ref[...], h.astype(jnp.bfloat16),
        dimension_numbers=(((1,), (1,)), ((), ())),
        preferred_element_type=jnp.float32) + b4_ref[...]
    o_ref[...] = jax.nn.sigmoid(logits).reshape(o_ref.shape)


def recommender_mlp(e3, params, tm):
    """e3: (B_pad, 1600) bf16, B_pad % tm == 0  ->  (B_pad // tm, 1, tm) f32."""
    b_pad, d_in = e3.shape
    w1, b1, w2, b2, w3, b3, w4, b4 = params
    n_tiles = b_pad // tm

    # weights / biases stay resident across all batch tiles
    resident = lambda a: pl.BlockSpec(a.shape, lambda i: (0,) * a.ndim)

    return pl.pallas_call(
        _mlp_kernel,
        out_shape=jax.ShapeDtypeStruct((n_tiles, 1, tm), jnp.float32),
        grid=(n_tiles,),
        in_specs=[pl.BlockSpec((tm, d_in), lambda i: (i, 0)),
                  resident(w1), resident(b1), resident(w2), resident(b2),
                  resident(w3), resident(b3), resident(w4), resident(b4)],
        out_specs=pl.BlockSpec((1, 1, tm), lambda i: (i, 0, 0)),
        compiler_params=pltpu.CompilerParams(
            dimension_semantics=("parallel",),       # megacore sharding on v7x
            vmem_limit_bytes=32 * 1024 * 1024),      # headroom for TM=1024
    )(e3, w1, b1, w2, b2, w3, b3, w4, b4)


def recommender_forward(s1, s2, emb_table, params, *, tm_max=1024):
    """Full forward: embedding lookup + concat + reshape (glue) + Pallas MLP."""
    B = s1.shape[0]

    # Batch tile: bf16 sublane multiple (16), capped at tm_max, and chosen so
    # the grid has >= 2 steps whenever possible (v7x has two TensorCores).
    tm = max(16, min(tm_max, _round_up(pl.cdiv(B, 2), 16)))
    b_pad = _round_up(B, tm)

    # Ragged batch: pad the int32 index arrays (cheap), not the activations.
    if b_pad != B:
        s1 = jnp.pad(s1, ((0, b_pad - B), (0, 0)))
        s2 = jnp.pad(s2, ((0, b_pad - B), (0, 0)))

    # TODO(synk): fuse the embedding gather/concat into the kernel (scalar
    # prefetch + DMA row gather) to avoid materializing e3 in HBM; general
    # gathers do not lower cleanly inside Mosaic, so it stays as XLA glue.
    e1 = jnp.take(emb_table, s1, axis=0)            # (B_pad, 50, D) bf16
    e2 = jnp.take(emb_table, s2, axis=0)            # (B_pad, 50, D) bf16
    e3 = jnp.concatenate([e1, e2], axis=1)          # (B_pad, 100, D) bf16
    e3 = e3.reshape(b_pad, -1)                      # (B_pad, 100*D), K = 1600

    out = recommender_mlp(e3, params, tm)           # (B_pad//tm, 1, tm) f32
    return out.reshape(b_pad, 1)[:B]


def _xavier_uniform(key, fan_in, fan_out):
    limit = jnp.sqrt(6.0 / (fan_in + fan_out))
    # stored as (in, out) so the kernel computes x @ W (== x @ W_torch.T)
    return jax.random.uniform(key, (fan_in, fan_out), jnp.float32, -limit, limit)


def init_params(key, vocab_size, embedding_dim):
    keys = jax.random.split(key, 5)
    # bf16 embedding table: the gather/concat glue materializes e3 directly in
    # bf16, halving the dominant end-to-end HBM traffic.
    emb = jax.random.uniform(keys[0], (vocab_size, embedding_dim),
                             jnp.float32, -0.05, 0.05).astype(jnp.bfloat16)
    d_in = embedding_dim * SEQ_LEN * 2

    w1 = _xavier_uniform(keys[1], d_in, 512).astype(jnp.bfloat16)   # (1600, 512)
    w2 = _xavier_uniform(keys[2], 512, 256).astype(jnp.bfloat16)
    w3 = _xavier_uniform(keys[3], 256, 128).astype(jnp.bfloat16)
    w4 = _xavier_uniform(keys[4], 128, 1).T.astype(jnp.bfloat16)    # (1, 128)

    b1 = jnp.full((1, 512), 0.01, jnp.float32)
    b2 = jnp.full((1, 256), 0.01, jnp.float32)
    b3 = jnp.full((1, 128), 0.01, jnp.float32)
    b4 = jnp.full((1, 1), 0.01, jnp.float32)
    return emb, (w1, b1, w2, b2, w3, b3, w4, b4)


if __name__ == "__main__":
    vocab_size = 100
    embedding_dim = 16
    batch = 2

    key = jax.random.PRNGKey(0)
    k_emb, k_s1, k_s2 = jax.random.split(key, 3)
    emb_table, params = init_params(k_emb, vocab_size, embedding_dim)

    s1 = jax.random.randint(k_s1, (batch, SEQ_LEN), 0, vocab_size, jnp.int32)
    s2 = jax.random.randint(k_s2, (batch, SEQ_LEN), 0, vocab_size, jnp.int32)

    out = recommender_forward(s1, s2, emb_table, params)
    jax.block_until_ready(out)

    # reference check in plain JAX (same bf16-in / f32-accumulate numerics)
    def ref(s1, s2):
        e1 = jnp.take(emb_table, s1, axis=0)
        e2 = jnp.take(emb_table, s2, axis=0)
        x = jnp.concatenate([e1, e2], axis=1).reshape(batch, -1)
        w1, b1, w2, b2, w3, b3, w4, b4 = params
        h = jnp.maximum(
            jnp.dot(x, w1, preferred_element_type=jnp.float32) + b1, 0.0)
        h = jnp.maximum(
            jnp.dot(h.astype(jnp.bfloat16), w2,
                    preferred_element_type=jnp.float32) + b2, 0.0)
        h = jnp.maximum(
            jnp.dot(h.astype(jnp.bfloat16), w3,
                    preferred_element_type=jnp.float32) + b3, 0.0)
        logits = jnp.dot(h.astype(jnp.bfloat16), w4.T,
                         preferred_element_type=jnp.float32) + b4
        return jax.nn.sigmoid(logits)

    expected = ref(s1, s2)
    assert out.shape == (batch, 1), out.shape
    assert jnp.allclose(out, expected, atol=2e-3, rtol=0), (
        jnp.max(jnp.abs(out - expected)))
    print("KERNEL_OK")
</pallas_src>

<mosaic_0001>
module attributes {stable_mosaic.version = 11 : i64} {
  func.func @_mlp_kernel(%arg0: i32, %arg1: memref<16x1600xbf16, #tpu.memory_space<vmem>>, %arg2: memref<1600x512xbf16, #tpu.memory_space<vmem>>, %arg3: memref<1x512xf32, #tpu.memory_space<vmem>>, %arg4: memref<512x256xbf16, #tpu.memory_space<vmem>>, %arg5: memref<1x256xf32, #tpu.memory_space<vmem>>, %arg6: memref<256x128xbf16, #tpu.memory_space<vmem>>, %arg7: memref<1x128xf32, #tpu.memory_space<vmem>>, %arg8: memref<1x128xbf16, #tpu.memory_space<vmem>>, %arg9: memref<1x1xf32, #tpu.memory_space<vmem>>, %arg10: memref<1x1x16xf32, #tpu.memory_space<vmem>>) attributes {dimension_semantics = [#tpu.dimension_semantics<parallel>], iteration_bounds = array<i64: 1>, scalar_prefetch = 0 : i64, scratch_operands = 0 : i64, tpu.core_type = #tpu.core_type<tc>, window_params = [{transform_indices = @transform_0, window_bounds = array<i64: 16, 1600>}, {pipeline_mode = #tpu.pipeline_mode<synchronous>, transform_indices = @transform_1, window_bounds = array<i64: 1600, 512>}, {pipeline_mode = #tpu.pipeline_mode<synchronous>, transform_indices = @transform_2, window_bounds = array<i64: 1, 512>}, {pipeline_mode = #tpu.pipeline_mode<synchronous>, transform_indices = @transform_3, window_bounds = array<i64: 512, 256>}, {pipeline_mode = #tpu.pipeline_mode<synchronous>, transform_indices = @transform_4, window_bounds = array<i64: 1, 256>}, {pipeline_mode = #tpu.pipeline_mode<synchronous>, transform_indices = @transform_5, window_bounds = array<i64: 256, 128>}, {pipeline_mode = #tpu.pipeline_mode<synchronous>, transform_indices = @transform_6, window_bounds = array<i64: 1, 128>}, {pipeline_mode = #tpu.pipeline_mode<synchronous>, transform_indices = @transform_7, window_bounds = array<i64: 1, 128>}, {pipeline_mode = #tpu.pipeline_mode<synchronous>, transform_indices = @transform_8, window_bounds = array<i64: 1, 1>}, {transform_indices = @transform_9, window_bounds = array<i64: 1, 1, 16>}]} {
    %c0 = arith.constant 0 : index
    %c0_0 = arith.constant 0 : index
    %0 = vector.load %arg1[%c0, %c0_0] : memref<16x1600xbf16, #tpu.memory_space<vmem>>, vector<16x1600xbf16>
    %c0_1 = arith.constant 0 : index
    %c0_2 = arith.constant 0 : index
    %1 = vector.load %arg2[%c0_1, %c0_2] : memref<1600x512xbf16, #tpu.memory_space<vmem>>, vector<1600x512xbf16>
    %cst = arith.constant dense<0.000000e+00> : vector<16x512xf32>
    %2 = tpu.matmul %0, %1, %cst {dimension_numbers = #tpu.dot_dimension_numbers<[1], [0], [0], [1], [0, 0, 1, 1], [], []>} : vector<16x1600xbf16>, vector<1600x512xbf16>, vector<16x512xf32> -> vector<16x512xf32>
    %c0_3 = arith.constant 0 : index
    %c0_4 = arith.constant 0 : index
    %3 = vector.load %arg3[%c0_3, %c0_4] : memref<1x512xf32, #tpu.memory_space<vmem>>, vector<1x512xf32>
    %4 = vector.broadcast %3 : vector<1x512xf32> to vector<16x512xf32>
    %5 = arith.addf %2, %4 : vector<16x512xf32>
    %cst_5 = arith.constant 0.000000e+00 : f32
    %6 = vector.broadcast %cst_5 : f32 to vector<16x512xf32>
    %7 = arith.maximumf %5, %6 : vector<16x512xf32>
    %8 = arith.truncf %7 : vector<16x512xf32> to vector<16x512xbf16>
    %c0_6 = arith.constant 0 : index
    %c0_7 = arith.constant 0 : index
    %9 = vector.load %arg4[%c0_6, %c0_7] : memref<512x256xbf16, #tpu.memory_space<vmem>>, vector<512x256xbf16>
    %cst_8 = arith.constant dense<0.000000e+00> : vector<16x256xf32>
    %10 = tpu.matmul %8, %9, %cst_8 {dimension_numbers = #tpu.dot_dimension_numbers<[1], [0], [0], [1], [0, 0, 1, 1], [], []>} : vector<16x512xbf16>, vector<512x256xbf16>, vector<16x256xf32> -> vector<16x256xf32>
    %c0_9 = arith.constant 0 : index
    %c0_10 = arith.constant 0 : index
    %11 = vector.load %arg5[%c0_9, %c0_10] : memref<1x256xf32, #tpu.memory_space<vmem>>, vector<1x256xf32>
    %12 = vector.broadcast %11 : vector<1x256xf32> to vector<16x256xf32>
    %13 = arith.addf %10, %12 : vector<16x256xf32>
    %cst_11 = arith.constant 0.000000e+00 : f32
    %14 = vector.broadcast %cst_11 : f32 to vector<16x256xf32>
    %15 = arith.maximumf %13, %14 : vector<16x256xf32>
    %16 = arith.truncf %15 : vector<16x256xf32> to vector<16x256xbf16>
    %c0_12 = arith.constant 0 : index
    %c0_13 = arith.constant 0 : index
    %17 = vector.load %arg6[%c0_12, %c0_13] : memref<256x128xbf16, #tpu.memory_space<vmem>>, vector<256x128xbf16>
    %cst_14 = arith.constant dense<0.000000e+00> : vector<16x128xf32>
    %18 = tpu.matmul %16, %17, %cst_14 {dimension_numbers = #tpu.dot_dimension_numbers<[1], [0], [0], [1], [0, 0, 1, 1], [], []>} : vector<16x256xbf16>, vector<256x128xbf16>, vector<16x128xf32> -> vector<16x128xf32>
    %c0_15 = arith.constant 0 : index
    %c0_16 = arith.constant 0 : index
    %19 = vector.load %arg7[%c0_15, %c0_16] : memref<1x128xf32, #tpu.memory_space<vmem>>, vector<1x128xf32>
    %20 = vector.broadcast %19 : vector<1x128xf32> to vector<16x128xf32>
    %21 = arith.addf %18, %20 : vector<16x128xf32>
    %cst_17 = arith.constant 0.000000e+00 : f32
    %22 = vector.broadcast %cst_17 : f32 to vector<16x128xf32>
    %23 = arith.maximumf %21, %22 : vector<16x128xf32>
    %c0_18 = arith.constant 0 : index
    %c0_19 = arith.constant 0 : index
    %24 = vector.load %arg8[%c0_18, %c0_19] : memref<1x128xbf16, #tpu.memory_space<vmem>>, vector<1x128xbf16>
    %25 = arith.truncf %23 : vector<16x128xf32> to vector<16x128xbf16>
    %cst_20 = arith.constant dense<0.000000e+00> : vector<1x16xf32>
    %26 = tpu.matmul %24, %25, %cst_20 {dimension_numbers = #tpu.dot_dimension_numbers<[1], [1], [0], [0], [0, 0, 1, 0], [], []>} : vector<1x128xbf16>, vector<16x128xbf16>, vector<1x16xf32> -> vector<1x16xf32>
    %c0_21 = arith.constant 0 : index
    %c0_22 = arith.constant 0 : index
    %27 = vector.load %arg9[%c0_21, %c0_22] : memref<1x1xf32, #tpu.memory_space<vmem>>, vector<1x1xf32>
    %28 = vector.broadcast %27 : vector<1x1xf32> to vector<1x16xf32>
    %29 = arith.addf %26, %28 : vector<1x16xf32>
    %30 = arith.negf %29 : vector<1x16xf32>
    %31 = math.exp %30 : vector<1x16xf32>
    %cst_23 = arith.constant 1.000000e+00 : f32
    %32 = vector.broadcast %cst_23 : f32 to vector<1x16xf32>
    %33 = arith.addf %32, %31 : vector<1x16xf32>
    %34 = arith.divf %32, %33 : vector<1x16xf32>
    %35 = vector.shape_cast %34 : vector<1x16xf32> to vector<1x1x16xf32>
    %c0_24 = arith.constant 0 : index
    %c0_25 = arith.constant 0 : index
    %c0_26 = arith.constant 0 : index
    %36 = vector.load %arg10[%c0_24, %c0_25, %c0_26] : memref<1x1x16xf32, #tpu.memory_space<vmem>>, vector<1x1x16xf32>
    tpu.vector_store %arg10[%c0_24, %c0_25, %c0_26], %35 {strides = array<i32>} : memref<1x1x16xf32, #tpu.memory_space<vmem>>, vector<1x1x16xf32>,
    return
  }
  func.func @transform_0(%arg0: i32) -> (i32, i32) {
    %c0_i32 = arith.constant 0 : i32
    %c0_i32_0 = arith.constant 0 : i32
    return %arg0, %c0_i32 : i32, i32
  }
  func.func @transform_1(%arg0: i32) -> (i32, i32) {
    %c0_i32 = arith.constant 0 : i32
    %c0_i32_0 = arith.constant 0 : i32
    %c0_i32_1 = arith.constant 0 : i32
    return %c0_i32, %c0_i32_0 : i32, i32
  }
  func.func @transform_2(%arg0: i32) -> (i32, i32) {
    %c0_i32 = arith.constant 0 : i32
    %c0_i32_0 = arith.constant 0 : i32
    %c0_i32_1 = arith.constant 0 : i32
    return %c0_i32, %c0_i32_0 : i32, i32
  }
  func.func @transform_3(%arg0: i32) -> (i32, i32) {
    %c0_i32 = arith.constant 0 : i32
    %c0_i32_0 = arith.constant 0 : i32
    %c0_i32_1 = arith.constant 0 : i32
    return %c0_i32, %c0_i32_0 : i32, i32
  }
  func.func @transform_4(%arg0: i32) -> (i32, i32) {
    %c0_i32 = arith.constant 0 : i32
    %c0_i32_0 = arith.constant 0 : i32
    %c0_i32_1 = arith.constant 0 : i32
    return %c0_i32, %c0_i32_0 : i32, i32
  }
  func.func @transform_5(%arg0: i32) -> (i32, i32) {
    %c0_i32 = arith.constant 0 : i32
    %c0_i32_0 = arith.constant 0 : i32
    %c0_i32_1 = arith.constant 0 : i32
    return %c0_i32, %c0_i32_0 : i32, i32
  }
  func.func @transform_6(%arg0: i32) -> (i32, i32) {
    %c0_i32 = arith.constant 0 : i32
    %c0_i32_0 = arith.constant 0 : i32
    %c0_i32_1 = arith.constant 0 : i32
    return %c0_i32, %c0_i32_0 : i32, i32
  }
  func.func @transform_7(%arg0: i32) -> (i32, i32) {
    %c0_i32 = arith.constant 0 : i32
    %c0_i32_0 = arith.constant 0 : i32
    %c0_i32_1 = arith.constant 0 : i32
    return %c0_i32, %c0_i32_0 : i32, i32
  }
  func.func @transform_8(%arg0: i32) -> (i32, i32) {
    %c0_i32 = arith.constant 0 : i32
    %c0_i32_0 = arith.constant 0 : i32
    %c0_i32_1 = arith.constant 0 : i32
    return %c0_i32, %c0_i32_0 : i32, i32
  }
  func.func @transform_9(%arg0: i32) -> (i32, i32, i32) {
    %c0_i32 = arith.constant 0 : i32
    %c0_i32_0 = arith.constant 0 : i32
    %c0_i32_1 = arith.constant 0 : i32
    return %arg0, %c0_i32, %c0_i32_0 : i32, i32, i32
  }
}

</mosaic_0001>

<bundles_post_ra>
// kernel: tpu_custom_call.1
= control target key start
LH: loop header
LB: loop body
LE: loop exit
PB: predicated region body
PF: predicated region fallthrough
CT: control target
= control target key end

     0   :  { %s5669_s0 = inlined_call_operand.hbm [shape: bf16[16,1600], index: 0, kind: input, shape index: {}]   ;;  %s5670_s1 = inlined_call_operand.hbm [shape: bf16[1600,512], index: 1, kind: input, shape index: {}]   ;;  %s5671_s2 = inlined_call_operand.hbm [shape: f32[1,512], index: 2, kind: input, shape index: {}]   ;;  %s5672_s3 = inlined_call_operand.hbm [shape: bf16[512,256], index: 3, kind: input, shape index: {}]   ;;  %s5673_s4 = inlined_call_operand.hbm [shape: f32[1,256], index: 4, kind: input, shape index: {}]   ;;  %s5674_s5 = inlined_call_operand.hbm [shape: bf16[256,128], index: 5, kind: input, shape index: {}]   ;;  %s5675_s6 = inlined_call_operand.hbm [shape: f32[1,128], index: 6, kind: input, shape index: {}]   ;;  %s5676_s7 = inlined_call_operand.hbm [shape: bf16[1,128], index: 7, kind: input, shape index: {}]   ;;  %s5677_s8 = inlined_call_operand.<no memory space> [shape: f32[1,1], index: 8, kind: input, shape index: {}]   ;;  %s5678_s9 = inlined_call_operand.hbm [shape: f32[1,1,16], index: 9, kind: output, shape index: {}]  }
   0x1   :  { %v14_v0 = vstv %s5677_s8 }
   0x2   :  { %15 = vst [vmem:[#allocation2] sm:$0x1] %v14_v0 }
   0x3   :  { %16 = vsyncpa [#allocation4], 0 }
   0x4   :  { %17 = vsyncpa [#allocation7], 0 }
   0x5   :  { %18 = vsyncpa [#allocation10], 0 }
   0x6   :  { %19 = vsyncpa [#allocation13], 0 }
   0x7   :  { %20 = vsyncpa [#allocation16], 0 }
   0x8   :  { %21 = vsyncpa [#allocation5], 0  ;;  %s5489_s11 = smov [#allocation6]  }
   0x9   :  { %s39_s12 = sshll.u32 %s5489_s11, 4  ;;  %s40_s12 = int_to_ptr.vmem [resolvable:$true] %s39_s12 }
   0xa   :  { %s5305_s13 = scalar_lea.vmem %s40_s12, 51200  ;;  %p5310_p1 = scmp.lt.s32.totalorder %s40_s12, %s40_s12 }
   0xb   :  { %p5306_p0 = scmp.ne.s32.totalorder %s40_s12, %s5305_s13  ;;  %p5311_p2 = scmp.lt.s32.totalorder %s5305_s13, %s5305_s13 }
   0xd   :  { %p5312_p3 = por %p5311_p2, %p5310_p1 }
   0xf   :  { %p5313_p4 = pnand %p5312_p3, %p5306_p0 }
  0x11   :  { %5316 = shalt.err (!%p5313_p4)
}
  0x12   :  { %s5490_s14 = smov 256   ;;  %s5491_s15 = smov 16  }
  0x13   :  { %45 = dma.hbm_to_vmem [thread:$0]  %s5670_s1, 51200, %s40_s12, [#allocation7], %s5490_s14, %s5490_s14, %s5491_s15  }
  0x14   :  { %s5492_s17 = smov [#allocation9]  }
  0x15   :  { %s61_s18 = sshll.u32 %s5492_s17, 4  ;;  %s62_s18 = int_to_ptr.vmem [resolvable:$true] %s61_s18 }
  0x16   :  { %s5325_s19 = scalar_lea.vmem %s62_s18, 8192  ;;  %p5330_p6 = scmp.lt.s32.totalorder %s62_s18, %s62_s18 }
  0x17   :  { %p5326_p5 = scmp.ne.s32.totalorder %s62_s18, %s5325_s19  ;;  %p5331_p7 = scmp.lt.s32.totalorder %s5325_s19, %s5325_s19 }
  0x19   :  { %p5332_p8 = por %p5331_p7, %p5330_p6 }
  0x1b   :  { %p5333_p9 = pnand %p5332_p8, %p5326_p5 }
  0x1d   :  { %5336 = shalt.err (!%p5333_p9)
}
  0x1e   :  { %s5493_s20 = smov 128   ;;  %s5494_s21 = smov 8  }
  0x1f   :  { %67 = dma.hbm_to_vmem [thread:$0]  %s5672_s3, 8192, %s62_s18, [#allocation10], %s5493_s20, %s5493_s20, %s5494_s21  }
  0x20   :  { %s5495_s24 = smov [#allocation12]  }
  0x21   :  { %s83_s25 = sshll.u32 %s5495_s24, 4  ;;  %s84_s25 = int_to_ptr.vmem [resolvable:$true] %s83_s25 }
  0x22   :  { %s5345_s1 = scalar_lea.vmem %s84_s25, 2048  ;;  %p5350_p11 = scmp.lt.s32.totalorder %s84_s25, %s84_s25 }
  0x23   :  { %p5346_p10 = scmp.ne.s32.totalorder %s84_s25, %s5345_s1  ;;  %p5351_p12 = scmp.lt.s32.totalorder %s5345_s1, %s5345_s1 }
  0x25   :  { %p5352_p13 = por %p5351_p12, %p5350_p11 }
  0x27   :  { %p5353_p0 = pnand %p5352_p13, %p5346_p10 }
  0x29   :  { %5356 = shalt.err (!%p5353_p0)
}
  0x2a   :  { %s5496_s26 = smov 64   ;;  %s5497_s27 = smov 4  }
  0x2b   :  { %89 = dma.hbm_to_vmem [thread:$0]  %s5674_s5, 2048, %s84_s25, [#allocation13], %s5496_s26, %s5496_s26, %s5497_s27  }
  0x2c   :  { %s5498_s30 = smov [#allocation3]  }
  0x2d   :  { %s27_s10 = sshll.u32 %s5498_s30, 4  ;;  %s28_s10 = int_to_ptr.vmem [resolvable:$true] %s27_s10 }
  0x2e   :  { %s5365_s3 = scalar_lea.vmem %s28_s10, 1664  ;;  %p5370_p2 = scmp.lt.s32.totalorder %s28_s10, %s28_s10 }
  0x2f   :  { %p5366_p1 = scmp.ne.s32.totalorder %s28_s10, %s5365_s3  ;;  %p5371_p3 = scmp.lt.s32.totalorder %s5365_s3, %s5365_s3 }
  0x31   :  { %p5372_p4 = por %p5371_p3, %p5370_p2 }
  0x33   :  { %p5373_p5 = pnand %p5372_p4, %p5366_p1 }
  0x35   :  { %5376 = shalt.err (!%p5373_p5)
}
  0x36   :  { %s5499_s11 = smov 832   ;;  %s5500_s12 = smov 52  }
  0x37   :  { %33 = dma.hbm_to_vmem [thread:$0]  %s5669_s0, 1664, %s28_s10, [#allocation4], %s5499_s11, %s5499_s11, %s5500_s12  }
  0x38   :  { %s5501_s15 = smov [#allocation8]   ;;  %s5502_s16 = smov [#allocation11]  }
  0x39   :  { %s52_s8 = sshll.u32 %s5501_s15, 4  ;;  %s74_s5 = sshll.u32 %s5502_s16, 4  ;;  %s53_s8 = int_to_ptr.vmem [resolvable:$true] %s52_s8  ;;  %s75_s5 = int_to_ptr.vmem [resolvable:$true] %s74_s5 }
  0x3a   :  { %s5385_s17 = scalar_lea.vmem %s53_s8, 64  ;;  %p5390_p7 = scmp.lt.s32.totalorder %s53_s8, %s53_s8 }
  0x3b   :  { %p5386_p6 = scmp.ne.s32.totalorder %s53_s8, %s5385_s17  ;;  %p5391_p8 = scmp.lt.s32.totalorder %s5385_s17, %s5385_s17 }
  0x3d   :  { %p5392_p9 = por %p5391_p8, %p5390_p7 }
  0x3f   :  { %p5393_p10 = pnand %p5392_p9, %p5386_p6 }
  0x41   :  { %5396 = shalt.err (!%p5393_p10)
}
  0x42   :  { %55 = dma.hbm_to_vmem [thread:$0]  %s5671_s2, 64, %s53_s8, [#allocation7]  }
  0x43   :  { %s5405_s20 = scalar_lea.vmem %s75_s5, 32  ;;  %p5410_p12 = scmp.lt.s32.totalorder %s75_s5, %s75_s5 }
  0x44   :  { %p5406_p11 = scmp.ne.s32.totalorder %s75_s5, %s5405_s20  ;;  %p5411_p13 = scmp.lt.s32.totalorder %s5405_s20, %s5405_s20 }
  0x46   :  { %p5412_p0 = por %p5411_p13, %p5410_p12 }
  0x48   :  { %p5413_p1 = pnand %p5412_p0, %p5406_p11 }
  0x4a   :  { %5416 = shalt.err (!%p5413_p1)
}
  0x4b   :  { %77 = dma.hbm_to_vmem [thread:$0]  %s5673_s4, 32, %s75_s5, [#allocation10]  }
  0x4c   :  { %s5503_s22 = smov [#allocation14]   ;;  %s5504_s24 = smov [#allocation15]  }
  0x4d   :  { %s96_s23 = sshll.u32 %s5503_s22, 4  ;;  %s106_s25 = sshll.u32 %s5504_s24, 4  ;;  %s97_s23 = int_to_ptr.vmem [resolvable:$true] %s96_s23  ;;  %s107_s25 = int_to_ptr.vmem [resolvable:$true] %s106_s25 }
  0x4e   :  { %s5425_s1 = scalar_lea.vmem %s97_s23, 16  ;;  %s5429_s2 = scalar_lea.vmem %s97_s23, 32 }
  0x4f   :  { %p5426_p2 = scmp.ne.s32.totalorder %s97_s23, %s5425_s1  ;;  %p5430_p3 = scmp.lt.s32.totalorder %s97_s23, %s97_s23 }
  0x50   :  { %p5431_p4 = scmp.lt.s32.totalorder %s5429_s2, %s5425_s1 }
  0x52   :  { %p5432_p5 = por %p5431_p4, %p5430_p3 }
  0x54   :  { %p5433_p6 = pnand %p5432_p5, %p5426_p2 }
  0x56   :  { %5436 = shalt.err (!%p5433_p6)
}
  0x57   :  { %99 = dma.hbm_to_vmem [thread:$0]  %s5675_s6, 16, %s97_s23, [#allocation13]  }
  0x58   :  { %s5445_s28 = scalar_lea.vmem %s107_s25, 16  ;;  %s5449_s4 = scalar_lea.vmem %s107_s25, 32 }
  0x59   :  { %p5446_p7 = scmp.ne.s32.totalorder %s107_s25, %s5445_s28  ;;  %p5450_p8 = scmp.lt.s32.totalorder %s107_s25, %s107_s25 }
  0x5a   :  { %p5451_p9 = scmp.lt.s32.totalorder %s5449_s4, %s5445_s28 }
  0x5c   :  { %p5452_p10 = por %p5451_p9, %p5450_p8 }
  0x5e   :  { %p5453_p11 = pnand %p5452_p10, %p5446_p7 }
  0x60   :  { %5456 = shalt.err (!%p5453_p11)
}
  0x61   :  { %109 = dma.hbm_to_vmem [thread:$0]  %s5676_s7, 16, %s107_s25, [#allocation16]  }
  0x62   :  { %5477 = dma.done.wait [#allocation4], 1664  }
  0x63   :  { %5478 = vsyncadd [#allocation4], 4294965632 }
  0x64   :  { %5479 = dma.done.wait [#allocation7], 51264  }
  0x65   :  { %5480 = vsyncadd [#allocation7], 4294916032 }
  0x66   :  { %5481 = dma.done.wait [#allocation10], 8224  }
  0x67   :  { %5482 = vsyncadd [#allocation10], 4294959072 }
  0x68   :  { %5483 = dma.done.wait [#allocation13], 2064  }
  0x69   :  { %5484 = vsyncadd [#allocation13], 4294965232 }
  0x6a   :  { %5485 = dma.done.wait [#allocation16], 16  }
  0x6b   :  { %5486 = vsyncadd [#allocation16], 4294967280  ;;  %v4549_v1 = vld [vmem:[#allocation6 + $0xe4] ss:$16 sps:$4 sm:$0xff]   ;;  %v4553_v3 = vld [vmem:[#allocation6 + $0xe0] ss:$16 sps:$4 sm:$0xff]  }
  0x6c   :  { %v4551_v2 = vld [vmem:[#allocation6 + $0x2e4] ss:$16 sps:$4 sm:$0xff]   ;;  %2642 = vmatprep.subr.bf16.mxu0 %v4549_v1  ;;  %v4554_v4 = vld [vmem:[#allocation6 + $0x2e0] ss:$16 sps:$4 sm:$0xff]   ;;  %vm2638_vm0 = vcmask 523264   ;;  %vm5507_vm1 = vmmov 0  }
  0x6d   :  { %2685 = vmatprep.subr.bf16.mxu1 %v4551_v2  ;;  %v4555_v5 = vld [vmem:[#allocation6 + $0xc4] ss:$16 sps:$4 sm:$0xff]   ;;  %2643 = vmatpush1.bf16.msra.mxu0 %v4553_v3  ;;  %v4559_v7 = vld [vmem:[#allocation6 + $0xc0] ss:$16 sps:$4 sm:$0xff]   ;;  %s5508_s6 = smov [#allocation17]   ;;  %vm3980_vm2 = vcmask 122880  }
  0x6e   :  { %2686 = vmatpush1.bf16.msra.mxu1 %v4554_v4  ;;  %v4557_v6 = vld [vmem:[#allocation6 + $0x2c4] ss:$16 sps:$4 sm:$0xff]   ;;  %2644 = vmatprep.subr.bf16.mxu0 %v4555_v5  ;;  %v4560_v8 = vld [vmem:[#allocation6 + $0x2c0] ss:$16 sps:$4 sm:$0xff]   ;;  %v4645_v5 = vld [vmem:[#allocation3] ss:$52 sps:$4 sm:$0xff]  }
  0x6f   :  { %2687 = vmatprep.subr.bf16.mxu1 %v4557_v6  ;;  %v4561_v9 = vld [vmem:[#allocation6 + $0xa4] ss:$16 sps:$4 sm:$0xff]   ;;  %v4565_v11 = vld [vmem:[#allocation6 + $0xa0] ss:$16 sps:$4 sm:$0xff]   ;;  %s3988_s7 = sshll.u32 %s5508_s6, 4  ;;  %s3989_s7 = int_to_ptr.vmem [resolvable:$true] %s3988_s7 }
  0x70   :  { %v4563_v10 = vld [vmem:[#allocation6 + $0x2a4] ss:$16 sps:$4 sm:$0xff]   ;;  %v4566_v12 = vld [vmem:[#allocation6 + $0x2a0] ss:$16 sps:$4 sm:$0xff]   ;;  %s5457_s10 = scalar_lea.vmem %s3989_s7, 16  ;;  %s5461_s3 = scalar_lea.vmem %s3989_s7, 32 }
  0x71   :  { %2645 = vmatpush1.bf16.msra.mxu0 %v4559_v7  ;;  %v4567_v13 = vld [vmem:[#allocation6 + $0x84] ss:$16 sps:$4 sm:$0xff]   ;;  %v4571_v15 = vld [vmem:[#allocation6 + $0x80] ss:$16 sps:$4 sm:$0xff]   ;;  %p5458_p12 = scmp.ne.s32.totalorder %s3989_s7, %s5457_s10  ;;  %p5462_p13 = scmp.lt.s32.totalorder %s3989_s7, %s3989_s7 }
  0x72   :  { %2688 = vmatpush1.bf16.msra.mxu1 %v4560_v8  ;;  %2646 = vmatprep.subr.bf16.mxu0 %v4561_v9  ;;  %v4569_v14 = vld [vmem:[#allocation6 + $0x284] ss:$16 sps:$4 sm:$0xff]   ;;  %v4572_v16 = vld [vmem:[#allocation6 + $0x280] ss:$16 sps:$4 sm:$0xff]   ;;  %p5463_p0 = scmp.lt.s32.totalorder %s5461_s3, %s5457_s10 }
  0x73   :  { %2689 = vmatprep.subr.bf16.mxu1 %v4563_v10  ;;  %v4573_v17 = vld [vmem:[#allocation6 + $0x64] ss:$16 sps:$4 sm:$0xff]   ;;  %v4577_v19 = vld [vmem:[#allocation6 + $0x60] ss:$16 sps:$4 sm:$0xff]  }
  0x74   :  { %v4575_v18 = vld [vmem:[#allocation6 + $0x264] ss:$16 sps:$4 sm:$0xff]   ;;  %v4578_v20 = vld [vmem:[#allocation6 + $0x260] ss:$16 sps:$4 sm:$0xff]   ;;  %p5464_p1 = por %p5463_p0, %p5462_p13 }
  0x75   :  { %2647 = vmatpush1.bf16.msra.mxu0 %v4565_v11  ;;  %v4579_v21 = vld [vmem:[#allocation6 + $0x44] ss:$16 sps:$4 sm:$0xff]   ;;  %v4583_v23 = vld [vmem:[#allocation6 + $0x40] ss:$16 sps:$4 sm:$0xff]  }
  0x76   :  { %2690 = vmatpush1.bf16.msra.mxu1 %v4566_v12  ;;  %2648 = vmatprep.subr.bf16.mxu0 %v4567_v13  ;;  %v4581_v22 = vld [vmem:[#allocation6 + $0x244] ss:$16 sps:$4 sm:$0xff]   ;;  %v4584_v24 = vld [vmem:[#allocation6 + $0x240] ss:$16 sps:$4 sm:$0xff]   ;;  %p5465_p2 = pnand %p5464_p1, %p5458_p12 }
  0x77   :  { %2691 = vmatprep.subr.bf16.mxu1 %v4569_v14  ;;  %v4585_v25 = vld [vmem:[#allocation6 + $0x24] ss:$16 sps:$4 sm:$0xff]   ;;  %v4589_v27 = vld [vmem:[#allocation6 + $0x20] ss:$16 sps:$4 sm:$0xff]  }
  0x78   :  { %v4587_v26 = vld [vmem:[#allocation6 + $0x224] ss:$16 sps:$4 sm:$0xff]   ;;  %v4590_v28 = vld [vmem:[#allocation6 + $0x220] ss:$16 sps:$4 sm:$0xff]  }
  0x79   :  { %2649 = vmatpush1.bf16.msra.mxu0 %v4571_v15  ;;  %v4591_v29 = vld [vmem:[#allocation6 + $0x4] ss:$16 sps:$4 sm:$0xff]   ;;  %v4595_v31 = vld [vmem:[#allocation6] ss:$16 sps:$4 sm:$0xff]  }
  0x7a   :  { %2692 = vmatpush1.bf16.msra.mxu1 %v4572_v16  ;;  %2650 = vmatprep.subr.bf16.mxu0 %v4573_v17  ;;  %v4593_v30 = vld [vmem:[#allocation6 + $0x204] ss:$16 sps:$4 sm:$0xff]   ;;  %v4596_v32 = vld [vmem:[#allocation6 + $0x200] ss:$16 sps:$4 sm:$0xff]  }
  0x7b   :  { %2693 = vmatprep.subr.bf16.mxu1 %v4575_v18  ;;  %v4597_v33 = vld [vmem:[#allocation6 + $0x1e4] ss:$16 sps:$4 sm:$0xff]   ;;  %v4601_v35 = vld [vmem:[#allocation6 + $0x1e0] ss:$16 sps:$4 sm:$0xff]  }
  0x7c   :  { %v4599_v34 = vld [vmem:[#allocation6 + $0x3e4] ss:$16 sps:$4 sm:$0xff]   ;;  %v4602_v36 = vld [vmem:[#allocation6 + $0x3e0] ss:$16 sps:$4 sm:$0xff]  }
  0x7d   :  { %2651 = vmatpush1.bf16.msra.mxu0 %v4577_v19  ;;  %v4603_v37 = vld [vmem:[#allocation6 + $0x1c4] ss:$16 sps:$4 sm:$0xff]   ;;  %v4607_v39 = vld [vmem:[#allocation6 + $0x1c0] ss:$16 sps:$4 sm:$0xff]  }
  0x7e   :  { %2694 = vmatpush1.bf16.msra.mxu1 %v4578_v20  ;;  %2652 = vmatprep.subr.bf16.mxu0 %v4579_v21  ;;  %v4605_v38 = vld [vmem:[#allocation6 + $0x3c4] ss:$16 sps:$4 sm:$0xff]   ;;  %v4608_v40 = vld [vmem:[#allocation6 + $0x3c0] ss:$16 sps:$4 sm:$0xff]  }
  0x7f   :  { %2695 = vmatprep.subr.bf16.mxu1 %v4581_v22  ;;  %v4609_v41 = vld [vmem:[#allocation6 + $0x1a4] ss:$16 sps:$4 sm:$0xff]   ;;  %v4613_v43 = vld [vmem:[#allocation6 + $0x1a0] ss:$16 sps:$4 sm:$0xff]  }
  0x80   :  { %v4611_v42 = vld [vmem:[#allocation6 + $0x3a4] ss:$16 sps:$4 sm:$0xff]   ;;  %v4614_v44 = vld [vmem:[#allocation6 + $0x3a0] ss:$16 sps:$4 sm:$0xff]  }
  0x81   :  { %2653 = vmatpush1.bf16.msra.mxu0 %v4583_v23  ;;  %v4615_v45 = vld [vmem:[#allocation6 + $0x184] ss:$16 sps:$4 sm:$0xff]   ;;  %v4619_v47 = vld [vmem:[#allocation6 + $0x180] ss:$16 sps:$4 sm:$0xff]  }
  0x82   :  { %2696 = vmatpush1.bf16.msra.mxu1 %v4584_v24  ;;  %2654 = vmatprep.subr.bf16.mxu0 %v4585_v25  ;;  %v4617_v46 = vld [vmem:[#allocation6 + $0x384] ss:$16 sps:$4 sm:$0xff]   ;;  %v4620_v48 = vld [vmem:[#allocation6 + $0x380] ss:$16 sps:$4 sm:$0xff]  }
  0x83   :  { %2697 = vmatprep.subr.bf16.mxu1 %v4587_v26  ;;  %v4621_v49 = vld [vmem:[#allocation6 + $0x164] ss:$16 sps:$4 sm:$0xff]   ;;  %v4647_v50 = vld [vmem:[#allocation3 + $0x4] ss:$52 sps:$4 sm:$0xff]  }
  0x84   :  { %v4623_v51 = vld [vmem:[#allocation6 + $0x364] ss:$16 sps:$4 sm:$0xff]   ;;  %2674 = vmatprep.mubr.bf16.mxu0 %v4647_v50  ;;  %v4625_v53 = vld [vmem:[#allocation6 + $0x160] ss:$16 sps:$4 sm:$0xff]  }
  0x85   :  { %2655 = vmatpush1.bf16.msra.mxu0 %v4589_v27  ;;  %v4650_v52 = vld [vmem:[#allocation3 + $0xc] ss:$52 sps:$4 sm:$0xff]   ;;  %v4626_v54 = vld [vmem:[#allocation6 + $0x360] ss:$16 sps:$4 sm:$0xff]   ;;  %v5505_v27 = vmov 0  }
  0x86   :  { %2698 = vmatpush1.bf16.msra.mxu1 %v4590_v28  ;;  %2656 = vmatprep.subr.bf16.mxu0 %v4591_v29  ;;  %v4627_v55 = vld [vmem:[#allocation6 + $0x144] ss:$16 sps:$4 sm:$0xff]   ;;  %v4631_v57 = vld [vmem:[#allocation6 + $0x140] ss:$16 sps:$4 sm:$0xff]  }
  0x87   :  { %2699 = vmatprep.subr.bf16.mxu1 %v4593_v30  ;;  %2717 = vmatprep.mubr.bf16.mxu1 %v4650_v52  ;;  %v4629_v56 = vld [vmem:[#allocation6 + $0x344] ss:$16 sps:$4 sm:$0xff]   ;;  %v4632_v58 = vld [vmem:[#allocation6 + $0x340] ss:$16 sps:$4 sm:$0xff]  }
  0x88   :  { %v4633_v59 = vld [vmem:[#allocation6 + $0x124] ss:$16 sps:$4 sm:$0xff]   ;;  %v4637_v61 = vld [vmem:[#allocation6 + $0x120] ss:$16 sps:$4 sm:$0xff]   ;;  %4548 = vset.pattern.permute.xlu0 %v5505_v27 }
  0x89   :  { %2657 = vmatpush1.bf16.msra.mxu0 %v4595_v31  ;;  %v4635_v60 = vld [vmem:[#allocation6 + $0x324] ss:$16 sps:$4 sm:$0xff]   ;;  %v4638_v62 = vld [vmem:[#allocation6 + $0x320] ss:$16 sps:$4 sm:$0xff]  }
  0x8a   :  { %2700 = vmatpush1.bf16.msra.mxu1 %v4596_v32  ;;  %2658 = vmatprep.subr.bf16.mxu0 %v4597_v33  ;;  %v4639_v63 = vld [vmem:[#allocation6 + $0x104] ss:$16 sps:$4 sm:$0xff]   ;;  %v4643_v1 = vld [vmem:[#allocation6 + $0x100] ss:$16 sps:$4 sm:$0xff]  }
  0x8b   :  { %2701 = vmatprep.subr.bf16.mxu1 %v4599_v34  ;;  %v4641_v0 = vld [vmem:[#allocation6 + $0x304] ss:$16 sps:$4 sm:$0xff]   ;;  %v4644_v2 = vld [vmem:[#allocation6 + $0x300] ss:$16 sps:$4 sm:$0xff]  }
  0x8c   :  { %v4653_v3 = vld [vmem:[#allocation6 + $0x4e4] ss:$16 sps:$4 sm:$0xff]   ;;  %v4651_v7 = vld [vmem:[#allocation6 + $0x4e0] ss:$16 sps:$4 sm:$0xff]  }
  0x8d   :  { %2659 = vmatpush2.bf16.msra.mxu0 %v4601_v35  ;;  %v4656_v4 = vld [vmem:[#allocation6 + $0x6e4] ss:$16 sps:$4 sm:$0xff]   ;;  %v4654_v8 = vld [vmem:[#allocation6 + $0x6e0] ss:$16 sps:$4 sm:$0xff]  }
  0x8e   :  { %2702 = vmatpush2.bf16.msra.mxu1 %v4602_v36  ;;  %2660 = vmatprep.subr.bf16.mxu0 %v4603_v37  ;;  %v4648_v6 = vld [vmem:[#allocation3 + $0x8] ss:$52 sps:$4 sm:$0xff]  }
  0x8f   :  { %2703 = vmatprep.subr.bf16.mxu1 %v4605_v38  ;;  %v4659_v9 = vld [vmem:[#allocation6 + $0x4c4] ss:$16 sps:$4 sm:$0xff]   ;;  %v4657_v11 = vld [vmem:[#allocation6 + $0x4c0] ss:$16 sps:$4 sm:$0xff]  }
  0x90   :  { %v4662_v10 = vld [vmem:[#allocation6 + $0x6c4] ss:$16 sps:$4 sm:$0xff]   ;;  %v4660_v12 = vld [vmem:[#allocation6 + $0x6c0] ss:$16 sps:$4 sm:$0xff]  }
  0x91   :  { %2661 = vmatpush2.bf16.msra.mxu0 %v4607_v39  ;;  %v4665_v13 = vld [vmem:[#allocation6 + $0x4a4] ss:$16 sps:$4 sm:$0xff]   ;;  %v4663_v15 = vld [vmem:[#allocation6 + $0x4a0] ss:$16 sps:$4 sm:$0xff]  }
  0x92   :  { %2704 = vmatpush2.bf16.msra.mxu1 %v4608_v40  ;;  %2662 = vmatprep.subr.bf16.mxu0 %v4609_v41  ;;  %v4668_v14 = vld [vmem:[#allocation6 + $0x6a4] ss:$16 sps:$4 sm:$0xff]   ;;  %v4666_v16 = vld [vmem:[#allocation6 + $0x6a0] ss:$16 sps:$4 sm:$0xff]  }
  0x93   :  { %2705 = vmatprep.subr.bf16.mxu1 %v4611_v42  ;;  %v4671_v17 = vld [vmem:[#allocation6 + $0x484] ss:$16 sps:$4 sm:$0xff]   ;;  %v4669_v19 = vld [vmem:[#allocation6 + $0x480] ss:$16 sps:$4 sm:$0xff]  }
  0x94   :  { %v4674_v18 = vld [vmem:[#allocation6 + $0x684] ss:$16 sps:$4 sm:$0xff]   ;;  %v4672_v20 = vld [vmem:[#allocation6 + $0x680] ss:$16 sps:$4 sm:$0xff]  }
  0x95   :  { %2663 = vmatpush2.bf16.msra.mxu0 %v4613_v43  ;;  %v4677_v21 = vld [vmem:[#allocation6 + $0x464] ss:$16 sps:$4 sm:$0xff]   ;;  %v4675_v23 = vld [vmem:[#allocation6 + $0x460] ss:$16 sps:$4 sm:$0xff]  }
  0x96   :  { %2706 = vmatpush2.bf16.msra.mxu1 %v4614_v44  ;;  %2664 = vmatprep.subr.bf16.mxu0 %v4615_v45  ;;  %v4680_v22 = vld [vmem:[#allocation6 + $0x664] ss:$16 sps:$4 sm:$0xff]   ;;  %v4678_v24 = vld [vmem:[#allocation6 + $0x660] ss:$16 sps:$4 sm:$0xff]  }
  0x97   :  { %2707 = vmatprep.subr.bf16.mxu1 %v4617_v46  ;;  %v4683_v25 = vld [vmem:[#allocation6 + $0x444] ss:$16 sps:$4 sm:$0xff]   ;;  %v4681_v28 = vld [vmem:[#allocation6 + $0x440] ss:$16 sps:$4 sm:$0xff]  }
  0x98   :  { %v4686_v26 = vld [vmem:[#allocation6 + $0x644] ss:$16 sps:$4 sm:$0xff]   ;;  %v4684_v29 = vld [vmem:[#allocation6 + $0x640] ss:$16 sps:$4 sm:$0xff]  }
  0x99   :  { %2665 = vmatpush2.bf16.msra.mxu0 %v4619_v47  ;;  %v4689_v30 = vld [vmem:[#allocation6 + $0x424] ss:$16 sps:$4 sm:$0xff]   ;;  %v4687_v32 = vld [vmem:[#allocation6 + $0x420] ss:$16 sps:$4 sm:$0xff]  }
  0x9a   :  { %2708 = vmatpush2.bf16.msra.mxu1 %v4620_v48  ;;  %2666 = vmatprep.subr.bf16.mxu0 %v4621_v49  ;;  %v4692_v31 = vld [vmem:[#allocation6 + $0x624] ss:$16 sps:$4 sm:$0xff]   ;;  %v4690_v33 = vld [vmem:[#allocation6 + $0x620] ss:$16 sps:$4 sm:$0xff]  }
  0x9b   :  { %2709 = vmatprep.subr.bf16.mxu1 %v4623_v51  ;;  %v4695_v34 = vld [vmem:[#allocation6 + $0x404] ss:$16 sps:$4 sm:$0xff]   ;;  %v4749_v36 = vld [vmem:[#allocation3 + $0x14] ss:$52 sps:$4 sm:$0xff]  }
  0x9c   :  { %v4698_v35 = vld [vmem:[#allocation6 + $0x604] ss:$16 sps:$4 sm:$0xff]   ;;  %v4693_v38 = vld [vmem:[#allocation6 + $0x400] ss:$16 sps:$4 sm:$0xff]  }
  0x9d   :  { %2667 = vmatpush2.bf16.msra.mxu0 %v4625_v53  ;;  %v4752_v37 = vld [vmem:[#allocation3 + $0x1c] ss:$52 sps:$4 sm:$0xff]   ;;  %v4696_v39 = vld [vmem:[#allocation6 + $0x600] ss:$16 sps:$4 sm:$0xff]  }
  0x9e   :  { %2710 = vmatpush2.bf16.msra.mxu1 %v4626_v54  ;;  %2668 = vmatprep.subr.bf16.mxu0 %v4627_v55  ;;  %v4701_v40 = vld [vmem:[#allocation6 + $0x5e4] ss:$16 sps:$4 sm:$0xff]   ;;  %v4699_v42 = vld [vmem:[#allocation6 + $0x5e0] ss:$16 sps:$4 sm:$0xff]  }
  0x9f   :  { %2711 = vmatprep.subr.bf16.mxu1 %v4629_v56  ;;  %v4704_v41 = vld [vmem:[#allocation6 + $0x7e4] ss:$16 sps:$4 sm:$0xff]   ;;  %v4702_v43 = vld [vmem:[#allocation6 + $0x7e0] ss:$16 sps:$4 sm:$0xff]  }
  0xa0   :  { %v4707_v44 = vld [vmem:[#allocation6 + $0x5c4] ss:$16 sps:$4 sm:$0xff]   ;;  %v4705_v46 = vld [vmem:[#allocation6 + $0x5c0] ss:$16 sps:$4 sm:$0xff]  }
  0xa1   :  { %2669 = vmatpush2.bf16.msra.mxu0 %v4631_v57  ;;  %v4710_v45 = vld [vmem:[#allocation6 + $0x7c4] ss:$16 sps:$4 sm:$0xff]   ;;  %v4708_v47 = vld [vmem:[#allocation6 + $0x7c0] ss:$16 sps:$4 sm:$0xff]  }
  0xa2   :  { %2712 = vmatpush2.bf16.msra.mxu1 %v4632_v58  ;;  %2670 = vmatprep.subr.bf16.mxu0 %v4633_v59  ;;  %v4713_v48 = vld [vmem:[#allocation6 + $0x5a4] ss:$16 sps:$4 sm:$0xff]   ;;  %v4711_v50 = vld [vmem:[#allocation6 + $0x5a0] ss:$16 sps:$4 sm:$0xff]  }
  0xa3   :  { %2713 = vmatprep.subr.bf16.mxu1 %v4635_v60  ;;  %v4716_v49 = vld [vmem:[#allocation6 + $0x7a4] ss:$16 sps:$4 sm:$0xff]   ;;  %v4714_v51 = vld [vmem:[#allocation6 + $0x7a0] ss:$16 sps:$4 sm:$0xff]  }
  0xa4   :  { %v4719_v52 = vld [vmem:[#allocation6 + $0x584] ss:$16 sps:$4 sm:$0xff]   ;;  %v4717_v54 = vld [vmem:[#allocation6 + $0x580] ss:$16 sps:$4 sm:$0xff]  }
  0xa5   :  { %2671 = vmatpush2.bf16.msra.mxu0 %v4637_v61  ;;  %v4722_v53 = vld [vmem:[#allocation6 + $0x784] ss:$16 sps:$4 sm:$0xff]   ;;  %v4720_v55 = vld [vmem:[#allocation6 + $0x780] ss:$16 sps:$4 sm:$0xff]  }
  0xa6   :  { %2714 = vmatpush2.bf16.msra.mxu1 %v4638_v62  ;;  %2672 = vmatprep.subr.bf16.mxu0 %v4639_v63  ;;  %v4725_v56 = vld [vmem:[#allocation6 + $0x564] ss:$16 sps:$4 sm:$0xff]   ;;  %v4723_v58 = vld [vmem:[#allocation6 + $0x560] ss:$16 sps:$4 sm:$0xff]  }
  0xa7   :  { %2715 = vmatprep.subr.bf16.mxu1 %v4641_v0  ;;  %v4728_v57 = vld [vmem:[#allocation6 + $0x764] ss:$16 sps:$4 sm:$0xff]   ;;  %v4726_v59 = vld [vmem:[#allocation6 + $0x760] ss:$16 sps:$4 sm:$0xff]  }
  0xa8   :  { %v4731_v60 = vld [vmem:[#allocation6 + $0x544] ss:$16 sps:$4 sm:$0xff]   ;;  %v4729_v62 = vld [vmem:[#allocation6 + $0x540] ss:$16 sps:$4 sm:$0xff]  }
  0xa9   :  { %2673 = vmatpush2.bf16.msra.mxu0 %v4643_v1  ;;  %v4734_v61 = vld [vmem:[#allocation6 + $0x744] ss:$16 sps:$4 sm:$0xff]   ;;  %v4732_v63 = vld [vmem:[#allocation6 + $0x740] ss:$16 sps:$4 sm:$0xff]  }
  0xaa   :  { %2716 = vmatpush2.bf16.msra.mxu1 %v4644_v2  ;;  %2728 = vmatprep.subr.bf16.mxu0 %v4653_v3  ;;  %v4737_v0 = vld [vmem:[#allocation6 + $0x524] ss:$16 sps:$4 sm:$0xff]   ;;  %v4735_v2 = vld [vmem:[#allocation6 + $0x520] ss:$16 sps:$4 sm:$0xff]  }
  0xab   :  { %2771 = vmatprep.subr.bf16.mxu1 %v4656_v4  ;;  %v4740_v1 = vld [vmem:[#allocation6 + $0x724] ss:$16 sps:$4 sm:$0xff]   ;;  %v4738_v3 = vld [vmem:[#allocation6 + $0x720] ss:$16 sps:$4 sm:$0xff]  }
  0xac   :  { %2675 = vmatmul.mubr.bf16.vlgmr.msra.gmra.mxu0 %v4645_v5  ;;  %v4743_v4 = vld [vmem:[#allocation6 + $0x504] ss:$16 sps:$4 sm:$0xff]  }
  0xad   :  { %2718 = vmatmul.mubr.bf16.vlgmr.msra.gmra.mxu1 %v4648_v6  ;;  %2729 = vmatpush1.bf16.msra.mxu0 %v4651_v7  ;;  %v4746_v5 = vld [vmem:[#allocation6 + $0x704] ss:$16 sps:$4 sm:$0xff]   ;;  %v4741_v6 = vld [vmem:[#allocation6 + $0x500] ss:$16 sps:$4 sm:$0xff]  }
  0xae   :  { %2772 = vmatpush1.bf16.msra.mxu1 %v4654_v8  ;;  %2730 = vmatprep.subr.bf16.mxu0 %v4659_v9  ;;  %v4744_v7 = vld [vmem:[#allocation6 + $0x700] ss:$16 sps:$4 sm:$0xff]   ;;  %v4755_v8 = vld [vmem:[#allocation6 + $0x8e4] ss:$16 sps:$4 sm:$0xff]  }
  0xaf   :  { %2773 = vmatprep.subr.bf16.mxu1 %v4662_v10  ;;  %2760 = vmatprep.mubr.bf16.mxu0 %v4749_v36  ;;  %v4758_v9 = vld [vmem:[#allocation6 + $0xae4] ss:$16 sps:$4 sm:$0xff]   ;;  %v4747_v10 = vld [vmem:[#allocation3 + $0x10] ss:$52 sps:$4 sm:$0xff]   ;;  %v4786_v36 = vld [vmem:[#allocation6 + $0xa40] ss:$16 sps:$4 sm:$0xff]  }
  0xb0   :  { %2803 = vmatprep.mubr.bf16.mxu1 %v4752_v37  ;;  %v4791_v37 = vld [vmem:[#allocation6 + $0x824] ss:$16 sps:$4 sm:$0xff]  }
  0xb1   :  { %2731 = vmatpush1.bf16.msra.mxu0 %v4657_v11  ;;  %v4750_v11 = vld [vmem:[#allocation3 + $0x18] ss:$52 sps:$4 sm:$0xff]  }
  0xb2   :  { %2774 = vmatpush1.bf16.msra.mxu1 %v4660_v12  ;;  %2732 = vmatprep.subr.bf16.mxu0 %v4665_v13  ;;  %v4753_v12 = vld [vmem:[#allocation6 + $0x8e0] ss:$16 sps:$4 sm:$0xff]  }
  0xb3   :  { %2775 = vmatprep.subr.bf16.mxu1 %v4668_v14  ;;  %v4756_v13 = vld [vmem:[#allocation6 + $0xae0] ss:$16 sps:$4 sm:$0xff]   ;;  %v4761_v14 = vld [vmem:[#allocation6 + $0x8c4] ss:$16 sps:$4 sm:$0xff]  }
  0xb5   :  { %2733 = vmatpush1.bf16.msra.mxu0 %v4663_v15  ;;  %v4764_v15 = vld [vmem:[#allocation6 + $0xac4] ss:$16 sps:$4 sm:$0xff]  }
  0xb6   :  { %2776 = vmatpush1.bf16.msra.mxu1 %v4666_v16  ;;  %2734 = vmatprep.subr.bf16.mxu0 %v4671_v17  ;;  %v4759_v16 = vld [vmem:[#allocation6 + $0x8c0] ss:$16 sps:$4 sm:$0xff]  }
  0xb7   :  { %2777 = vmatprep.subr.bf16.mxu1 %v4674_v18  ;;  %v4762_v17 = vld [vmem:[#allocation6 + $0xac0] ss:$16 sps:$4 sm:$0xff]   ;;  %v4767_v18 = vld [vmem:[#allocation6 + $0x8a4] ss:$16 sps:$4 sm:$0xff]  }
  0xb9   :  { %2735 = vmatpush1.bf16.msra.mxu0 %v4669_v19  ;;  %v4770_v19 = vld [vmem:[#allocation6 + $0xaa4] ss:$16 sps:$4 sm:$0xff]  }
  0xba   :  { %2778 = vmatpush1.bf16.msra.mxu1 %v4672_v20  ;;  %2736 = vmatprep.subr.bf16.mxu0 %v4677_v21  ;;  %v4765_v20 = vld [vmem:[#allocation6 + $0x8a0] ss:$16 sps:$4 sm:$0xff]  }
  0xbb   :  { %2779 = vmatprep.subr.bf16.mxu1 %v4680_v22  ;;  %v4851_v21 = vld [vmem:[#allocation3 + $0x24] ss:$52 sps:$4 sm:$0xff]  }
  0xbc   :  { %v4768_v22 = vld [vmem:[#allocation6 + $0xaa0] ss:$16 sps:$4 sm:$0xff]  }
  0xbd   :  { %2737 = vmatpush1.bf16.msra.mxu0 %v4675_v23  ;;  %v4854_v23 = vld [vmem:[#allocation3 + $0x2c] ss:$52 sps:$4 sm:$0xff]  }
  0xbe   :  { %2780 = vmatpush1.bf16.msra.mxu1 %v4678_v24  ;;  %2738 = vmatprep.subr.bf16.mxu0 %v4683_v25  ;;  %v4773_v24 = vld [vmem:[#allocation6 + $0x884] ss:$16 sps:$4 sm:$0xff]  }
  0xbf   :  { %2781 = vmatprep.subr.bf16.mxu1 %v4686_v26  ;;  %v4776_v25 = vld [vmem:[#allocation6 + $0xa84] ss:$16 sps:$4 sm:$0xff]   ;;  %v4771_v26 = vld [vmem:[#allocation6 + $0x880] ss:$16 sps:$4 sm:$0xff]  }
  0xc1   :  { %2739 = vmatpush1.bf16.msra.mxu0 %v4681_v28  ;;  %v4774_v28 = vld [vmem:[#allocation6 + $0xa80] ss:$16 sps:$4 sm:$0xff]  }
  0xc2   :  { %2782 = vmatpush1.bf16.msra.mxu1 %v4684_v29  ;;  %2740 = vmatprep.subr.bf16.mxu0 %v4689_v30  ;;  %v4779_v29 = vld [vmem:[#allocation6 + $0x864] ss:$16 sps:$4 sm:$0xff]  }
  0xc3   :  { %2783 = vmatprep.subr.bf16.mxu1 %v4692_v31  ;;  %v4782_v30 = vld [vmem:[#allocation6 + $0xa64] ss:$16 sps:$4 sm:$0xff]   ;;  %v4777_v31 = vld [vmem:[#allocation6 + $0x860] ss:$16 sps:$4 sm:$0xff]  }
  0xc5   :  { %2741 = vmatpush1.bf16.msra.mxu0 %v4687_v32  ;;  %v4780_v32 = vld [vmem:[#allocation6 + $0xa60] ss:$16 sps:$4 sm:$0xff]  }
  0xc6   :  { %2784 = vmatpush1.bf16.msra.mxu1 %v4690_v33  ;;  %2742 = vmatprep.subr.bf16.mxu0 %v4695_v34  ;;  %v4785_v33 = vld [vmem:[#allocation6 + $0x844] ss:$16 sps:$4 sm:$0xff]  }
  0xc7   :  { %2785 = vmatprep.subr.bf16.mxu1 %v4698_v35  ;;  %v4788_v34 = vld [vmem:[#allocation6 + $0xa44] ss:$16 sps:$4 sm:$0xff]   ;;  %v4783_v35 = vld [vmem:[#allocation6 + $0x840] ss:$16 sps:$4 sm:$0xff]  }
  0xc9   :  { %2743 = vmatpush1.bf16.msra.mxu0 %v4693_v38  ;;  %v4794_v38 = vld [vmem:[#allocation6 + $0xa24] ss:$16 sps:$4 sm:$0xff]  }
  0xca   :  { %2786 = vmatpush1.bf16.msra.mxu1 %v4696_v39  ;;  %2744 = vmatprep.subr.bf16.mxu0 %v4701_v40  ;;  %v4789_v39 = vld [vmem:[#allocation6 + $0x820] ss:$16 sps:$4 sm:$0xff]  }
  0xcb   :  { %2787 = vmatprep.subr.bf16.mxu1 %v4704_v41  ;;  %v4792_v40 = vld [vmem:[#allocation6 + $0xa20] ss:$16 sps:$4 sm:$0xff]   ;;  %v4797_v41 = vld [vmem:[#allocation6 + $0x804] ss:$16 sps:$4 sm:$0xff]  }
  0xcd   :  { %2745 = vmatpush2.bf16.msra.mxu0 %v4699_v42  ;;  %v4800_v42 = vld [vmem:[#allocation6 + $0xa04] ss:$16 sps:$4 sm:$0xff]  }
  0xce   :  { %2788 = vmatpush2.bf16.msra.mxu1 %v4702_v43  ;;  %2746 = vmatprep.subr.bf16.mxu0 %v4707_v44  ;;  %v4795_v43 = vld [vmem:[#allocation6 + $0x800] ss:$16 sps:$4 sm:$0xff]  }
  0xcf   :  { %2789 = vmatprep.subr.bf16.mxu1 %v4710_v45  ;;  %v4798_v44 = vld [vmem:[#allocation6 + $0xa00] ss:$16 sps:$4 sm:$0xff]   ;;  %v4803_v45 = vld [vmem:[#allocation6 + $0x9e4] ss:$16 sps:$4 sm:$0xff]  }
  0xd1   :  { %2747 = vmatpush2.bf16.msra.mxu0 %v4705_v46  ;;  %v4806_v46 = vld [vmem:[#allocation6 + $0xbe4] ss:$16 sps:$4 sm:$0xff]  }
  0xd2   :  { %2790 = vmatpush2.bf16.msra.mxu1 %v4708_v47  ;;  %2748 = vmatprep.subr.bf16.mxu0 %v4713_v48  ;;  %v4801_v47 = vld [vmem:[#allocation6 + $0x9e0] ss:$16 sps:$4 sm:$0xff]  }
  0xd3   :  { %2791 = vmatprep.subr.bf16.mxu1 %v4716_v49  ;;  %v4804_v48 = vld [vmem:[#allocation6 + $0xbe0] ss:$16 sps:$4 sm:$0xff]   ;;  %v4809_v49 = vld [vmem:[#allocation6 + $0x9c4] ss:$16 sps:$4 sm:$0xff]  }
  0xd5   :  { %2749 = vmatpush2.bf16.msra.mxu0 %v4711_v50  ;;  %v4812_v50 = vld [vmem:[#allocation6 + $0xbc4] ss:$16 sps:$4 sm:$0xff]  }
  0xd6   :  { %2792 = vmatpush2.bf16.msra.mxu1 %v4714_v51  ;;  %2750 = vmatprep.subr.bf16.mxu0 %v4719_v52  ;;  %v4807_v51 = vld [vmem:[#allocation6 + $0x9c0] ss:$16 sps:$4 sm:$0xff]  }
  0xd7   :  { %2793 = vmatprep.subr.bf16.mxu1 %v4722_v53  ;;  %v4810_v52 = vld [vmem:[#allocation6 + $0xbc0] ss:$16 sps:$4 sm:$0xff]   ;;  %v4815_v53 = vld [vmem:[#allocation6 + $0x9a4] ss:$16 sps:$4 sm:$0xff]  }
  0xd9   :  { %2751 = vmatpush2.bf16.msra.mxu0 %v4717_v54  ;;  %v4818_v54 = vld [vmem:[#allocation6 + $0xba4] ss:$16 sps:$4 sm:$0xff]  }
  0xda   :  { %2794 = vmatpush2.bf16.msra.mxu1 %v4720_v55  ;;  %2752 = vmatprep.subr.bf16.mxu0 %v4725_v56  ;;  %v4813_v55 = vld [vmem:[#allocation6 + $0x9a0] ss:$16 sps:$4 sm:$0xff]  }
  0xdb   :  { %2795 = vmatprep.subr.bf16.mxu1 %v4728_v57  ;;  %v4816_v56 = vld [vmem:[#allocation6 + $0xba0] ss:$16 sps:$4 sm:$0xff]   ;;  %v4821_v57 = vld [vmem:[#allocation6 + $0x984] ss:$16 sps:$4 sm:$0xff]  }
  0xdd   :  { %2753 = vmatpush2.bf16.msra.mxu0 %v4723_v58  ;;  %v4824_v58 = vld [vmem:[#allocation6 + $0xb84] ss:$16 sps:$4 sm:$0xff]  }
  0xde   :  { %2796 = vmatpush2.bf16.msra.mxu1 %v4726_v59  ;;  %2754 = vmatprep.subr.bf16.mxu0 %v4731_v60  ;;  %v4819_v59 = vld [vmem:[#allocation6 + $0x980] ss:$16 sps:$4 sm:$0xff]  }
  0xdf   :  { %2797 = vmatprep.subr.bf16.mxu1 %v4734_v61  ;;  %v4822_v60 = vld [vmem:[#allocation6 + $0xb80] ss:$16 sps:$4 sm:$0xff]   ;;  %v4827_v61 = vld [vmem:[#allocation6 + $0x964] ss:$16 sps:$4 sm:$0xff]  }
  0xe1   :  { %2755 = vmatpush2.bf16.msra.mxu0 %v4729_v62  ;;  %v4830_v62 = vld [vmem:[#allocation6 + $0xb64] ss:$16 sps:$4 sm:$0xff]  }
  0xe2   :  { %2798 = vmatpush2.bf16.msra.mxu1 %v4732_v63  ;;  %2756 = vmatprep.subr.bf16.mxu0 %v4737_v0  ;;  %v4825_v63 = vld [vmem:[#allocation6 + $0x960] ss:$16 sps:$4 sm:$0xff]  }
  0xe3   :  { %2799 = vmatprep.subr.bf16.mxu1 %v4740_v1  ;;  %v4828_v0 = vld [vmem:[#allocation6 + $0xb60] ss:$16 sps:$4 sm:$0xff]   ;;  %v4833_v1 = vld [vmem:[#allocation6 + $0x944] ss:$16 sps:$4 sm:$0xff]  }
  0xe5   :  { %2757 = vmatpush2.bf16.msra.mxu0 %v4735_v2  ;;  %v4836_v2 = vld [vmem:[#allocation6 + $0xb44] ss:$16 sps:$4 sm:$0xff]  }
  0xe6   :  { %2800 = vmatpush2.bf16.msra.mxu1 %v4738_v3  ;;  %2758 = vmatprep.subr.bf16.mxu0 %v4743_v4  ;;  %v4831_v3 = vld [vmem:[#allocation6 + $0x940] ss:$16 sps:$4 sm:$0xff]  }
  0xe7   :  { %2801 = vmatprep.subr.bf16.mxu1 %v4746_v5  ;;  %v4834_v4 = vld [vmem:[#allocation6 + $0xb40] ss:$16 sps:$4 sm:$0xff]   ;;  %v4839_v5 = vld [vmem:[#allocation6 + $0x924] ss:$16 sps:$4 sm:$0xff]  }
  0xe9   :  { %2759 = vmatpush2.bf16.msra.mxu0 %v4741_v6  ;;  %v4842_v6 = vld [vmem:[#allocation6 + $0xb24] ss:$16 sps:$4 sm:$0xff]  }
  0xea   :  { %2802 = vmatpush2.bf16.msra.mxu1 %v4744_v7  ;;  %2814 = vmatprep.subr.bf16.mxu0 %v4755_v8  ;;  %v4837_v7 = vld [vmem:[#allocation6 + $0x920] ss:$16 sps:$4 sm:$0xff]  }
  0xeb   :  { %2857 = vmatprep.subr.bf16.mxu1 %v4758_v9  ;;  %v4840_v8 = vld [vmem:[#allocation6 + $0xb20] ss:$16 sps:$4 sm:$0xff]   ;;  %v4845_v9 = vld [vmem:[#allocation6 + $0x904] ss:$16 sps:$4 sm:$0xff]  }
  0xec   :  { %2761 = vmatmul.mubr.bf16.vlgmr.msra.gmra.mxu0 %v4747_v10  ;;  %v4848_v10 = vld [vmem:[#allocation6 + $0xb04] ss:$16 sps:$4 sm:$0xff]  }
  0xed   :  { %2804 = vmatmul.mubr.bf16.vlgmr.msra.gmra.mxu1 %v4750_v11  ;;  %2815 = vmatpush1.bf16.msra.mxu0 %v4753_v12  ;;  %v4843_v11 = vld [vmem:[#allocation6 + $0x900] ss:$16 sps:$4 sm:$0xff]  }
  0xee   :  { %2858 = vmatpush1.bf16.msra.mxu1 %v4756_v13  ;;  %2816 = vmatprep.subr.bf16.mxu0 %v4761_v14  ;;  %v4846_v12 = vld [vmem:[#allocation6 + $0xb00] ss:$16 sps:$4 sm:$0xff]   ;;  %v4857_v13 = vld [vmem:[#allocation6 + $0xc64] ss:$16 sps:$4 sm:$0xff]   ;;  %v4860_v14 = vld [vmem:[#allocation6 + $0x2ec] ss:$16 sps:$4 sm:$0xff]  }
  0xef   :  { %2859 = vmatprep.subr.bf16.mxu1 %v4764_v15  ;;  %2846 = vmatprep.mubr.bf16.mxu0 %v4851_v21  ;;  %v4849_v15 = vld [vmem:[#allocation3 + $0x20] ss:$52 sps:$4 sm:$0xff]   ;;  %v4861_v21 = vld [vmem:[#allocation6 + $0xc40] ss:$16 sps:$4 sm:$0xff]  }
  0xf0   :  { %2889 = vmatprep.mubr.bf16.mxu1 %v4854_v23  ;;  %v4869_v23 = vld [vmem:[#allocation6 + $0xc24] ss:$16 sps:$4 sm:$0xff]  }
  0xf1   :  { %2817 = vmatpush1.bf16.msra.mxu0 %v4759_v16  ;;  %v4852_v16 = vld [vmem:[#allocation3 + $0x28] ss:$52 sps:$4 sm:$0xff]  }
  0xf2   :  { %2860 = vmatpush1.bf16.msra.mxu1 %v4762_v17  ;;  %2818 = vmatprep.subr.bf16.mxu0 %v4767_v18  ;;  %v4855_v17 = vld [vmem:[#allocation6 + $0xc60] ss:$16 sps:$4 sm:$0xff]   ;;  %v4858_v18 = vld [vmem:[#allocation6 + $0x2e8] ss:$16 sps:$4 sm:$0xff]  }
  0xf3   :  { %2861 = vmatprep.subr.bf16.mxu1 %v4770_v19  ;;  %v4863_v19 = vld [vmem:[#allocation6 + $0xc44] ss:$16 sps:$4 sm:$0xff]  }
  0xf5   :  { %2819 = vmatpush1.bf16.msra.mxu0 %v4765_v20  ;;  %v4866_v20 = vld [vmem:[#allocation6 + $0x2cc] ss:$16 sps:$4 sm:$0xff]  }
  0xf6   :  { %2862 = vmatpush1.bf16.msra.mxu1 %v4768_v22  ;;  %2820 = vmatprep.subr.bf16.mxu0 %v4773_v24  ;;  %v4864_v22 = vld [vmem:[#allocation6 + $0x2c8] ss:$16 sps:$4 sm:$0xff]   ;;  %v4872_v24 = vld [vmem:[#allocation6 + $0x2ac] ss:$16 sps:$4 sm:$0xff]  }
  0xf7   :  { %2863 = vmatprep.subr.bf16.mxu1 %v4776_v25  ;;  %v5284_v25 = vld [vmem:[#allocation3 + $0xc] ss:$52 sps:$4 sm:$0xff]  }
  0xf9   :  { %2821 = vmatpush1.bf16.msra.mxu0 %v4771_v26  ;;  %v4867_v26 = vld [vmem:[#allocation6 + $0xc20] ss:$16 sps:$4 sm:$0xff]  }
  0xfa   :  { %2864 = vmatpush1.bf16.msra.mxu1 %v4774_v28  ;;  %2822 = vmatprep.subr.bf16.mxu0 %v4779_v29  ;;  %v4870_v28 = vld [vmem:[#allocation6 + $0x2a8] ss:$16 sps:$4 sm:$0xff]   ;;  %v4875_v29 = vld [vmem:[#allocation6 + $0xc04] ss:$16 sps:$4 sm:$0xff]  }
  0xfb   :  { %2865 = vmatprep.subr.bf16.mxu1 %v4782_v30  ;;  %v4878_v30 = vld [vmem:[#allocation6 + $0x28c] ss:$16 sps:$4 sm:$0xff]  }
  0xfd   :  { %2823 = vmatpush1.bf16.msra.mxu0 %v4777_v31  ;;  %v4873_v31 = vld [vmem:[#allocation6 + $0xc00] ss:$16 sps:$4 sm:$0xff]  }
  0xfe   :  { %2866 = vmatpush1.bf16.msra.mxu1 %v4780_v32  ;;  %2824 = vmatprep.subr.bf16.mxu0 %v4785_v33  ;;  %v4876_v32 = vld [vmem:[#allocation6 + $0x288] ss:$16 sps:$4 sm:$0xff]   ;;  %v4882_v33 = vld [vmem:[#allocation6 + $0xec] ss:$16 sps:$4 sm:$0xff]  }
  0xff   :  { %2867 = vmatprep.subr.bf16.mxu1 %v4788_v34  ;;  %v4885_v34 = vld [vmem:[#allocation6 + $0x26c] ss:$16 sps:$4 sm:$0xff]  }
 0x101   :  { %2825 = vmatpush1.bf16.msra.mxu0 %v4783_v35  ;;  %v4879_v35 = vld [vmem:[#allocation3 + $0x30] ss:$52 sps:$4 sm:$0xff]  }
 0x102   :  { %2868 = vmatpush1.bf16.msra.mxu1 %v4786_v36  ;;  %2826 = vmatprep.subr.bf16.mxu0 %v4791_v37  ;;  %v4880_v36 = vld [vmem:[#allocation6 + $0xe8] ss:$16 sps:$4 sm:$0xff]  }
 0x103   :  { %2869 = vmatprep.subr.bf16.mxu1 %v4794_v38  ;;  %v4883_v37 = vld [vmem:[#allocation6 + $0x268] ss:$16 sps:$4 sm:$0xff]   ;;  %v4888_v38 = vld [vmem:[#allocation6 + $0xcc] ss:$16 sps:$4 sm:$0xff]  }
 0x105   :  { %2827 = vmatpush1.bf16.msra.mxu0 %v4789_v39  ;;  %v4891_v39 = vld [vmem:[#allocation6 + $0x24c] ss:$16 sps:$4 sm:$0xff]  }
 0x106   :  { %2870 = vmatpush1.bf16.msra.mxu1 %v4792_v40  ;;  %2828 = vmatprep.subr.bf16.mxu0 %v4797_v41  ;;  %v4886_v40 = vld [vmem:[#allocation6 + $0xc8] ss:$16 sps:$4 sm:$0xff]  }
 0x107   :  { %2871 = vmatprep.subr.bf16.mxu1 %v4800_v42  ;;  %v4889_v41 = vld [vmem:[#allocation6 + $0x248] ss:$16 sps:$4 sm:$0xff]   ;;  %v4894_v42 = vld [vmem:[#allocation6 + $0xac] ss:$16 sps:$4 sm:$0xff]  }
 0x109   :  { %2829 = vmatpush1.bf16.msra.mxu0 %v4795_v43  ;;  %v4897_v43 = vld [vmem:[#allocation6 + $0x22c] ss:$16 sps:$4 sm:$0xff]  }
 0x10a   :  { %2872 = vmatpush1.bf16.msra.mxu1 %v4798_v44  ;;  %2830 = vmatprep.subr.bf16.mxu0 %v4803_v45  ;;  %v5285_v44 = vld [vmem:[#allocation3 + $0x4] ss:$52 sps:$4 sm:$0xff]   ;;  %v4892_v45 = vld [vmem:[#allocation6 + $0xa8] ss:$16 sps:$4 sm:$0xff]  }
 0x10b   :  { %2873 = vmatprep.subr.bf16.mxu1 %v4806_v46  ;;  %v4895_v46 = vld [vmem:[#allocation6 + $0x228] ss:$16 sps:$4 sm:$0xff]  }
 0x10d   :  { %2831 = vmatpush2.bf16.msra.mxu0 %v4801_v47  ;;  %v4900_v47 = vld [vmem:[#allocation6 + $0x8c] ss:$16 sps:$4 sm:$0xff]  }
 0x10e   :  { %2874 = vmatpush2.bf16.msra.mxu1 %v4804_v48  ;;  %2832 = vmatprep.subr.bf16.mxu0 %v4809_v49  ;;  %v4903_v48 = vld [vmem:[#allocation6 + $0x20c] ss:$16 sps:$4 sm:$0xff]   ;;  %v4898_v49 = vld [vmem:[#allocation6 + $0x88] ss:$16 sps:$4 sm:$0xff]  }
 0x10f   :  { %2875 = vmatprep.subr.bf16.mxu1 %v4812_v50  ;;  %v4901_v50 = vld [vmem:[#allocation6 + $0x208] ss:$16 sps:$4 sm:$0xff]  }
 0x111   :  { %2833 = vmatpush2.bf16.msra.mxu0 %v4807_v51  ;;  %v4906_v51 = vld [vmem:[#allocation6 + $0x6c] ss:$16 sps:$4 sm:$0xff]  }
 0x112   :  { %2876 = vmatpush2.bf16.msra.mxu1 %v4810_v52  ;;  %2834 = vmatprep.subr.bf16.mxu0 %v4815_v53  ;;  %v4909_v52 = vld [vmem:[#allocation6 + $0x3ec] ss:$16 sps:$4 sm:$0xff]   ;;  %v4904_v53 = vld [vmem:[#allocation6 + $0x68] ss:$16 sps:$4 sm:$0xff]  }
 0x113   :  { %2877 = vmatprep.subr.bf16.mxu1 %v4818_v54  ;;  %v4907_v54 = vld [vmem:[#allocation6 + $0x3e8] ss:$16 sps:$4 sm:$0xff]  }
 0x115   :  { %2835 = vmatpush2.bf16.msra.mxu0 %v4813_v55  ;;  %v4912_v55 = vld [vmem:[#allocation6 + $0x4c] ss:$16 sps:$4 sm:$0xff]  }
 0x116   :  { %2878 = vmatpush2.bf16.msra.mxu1 %v4816_v56  ;;  %2836 = vmatprep.subr.bf16.mxu0 %v4821_v57  ;;  %v4915_v56 = vld [vmem:[#allocation6 + $0x3cc] ss:$16 sps:$4 sm:$0xff]   ;;  %v4910_v57 = vld [vmem:[#allocation6 + $0x48] ss:$16 sps:$4 sm:$0xff]  }
 0x117   :  { %2879 = vmatprep.subr.bf16.mxu1 %v4824_v58  ;;  %v4913_v58 = vld [vmem:[#allocation6 + $0x3c8] ss:$16 sps:$4 sm:$0xff]  }
 0x119   :  { %2837 = vmatpush2.bf16.msra.mxu0 %v4819_v59  ;;  %v4918_v59 = vld [vmem:[#allocation6 + $0x2c] ss:$16 sps:$4 sm:$0xff]  }
 0x11a   :  { %2880 = vmatpush2.bf16.msra.mxu1 %v4822_v60  ;;  %2838 = vmatprep.subr.bf16.mxu0 %v4827_v61  ;;  %v4921_v60 = vld [vmem:[#allocation6 + $0x3ac] ss:$16 sps:$4 sm:$0xff]   ;;  %v4916_v61 = vld [vmem:[#allocation6 + $0x28] ss:$16 sps:$4 sm:$0xff]  }
 0x11b   :  { %2881 = vmatprep.subr.bf16.mxu1 %v4830_v62  ;;  %v4919_v62 = vld [vmem:[#allocation6 + $0x3a8] ss:$16 sps:$4 sm:$0xff]  }
 0x11d   :  { %2839 = vmatpush2.bf16.msra.mxu0 %v4825_v63  ;;  %v4924_v63 = vld [vmem:[#allocation6 + $0xc] ss:$16 sps:$4 sm:$0xff]  }
 0x11e   :  { %2882 = vmatpush2.bf16.msra.mxu1 %v4828_v0  ;;  %2840 = vmatprep.subr.bf16.mxu0 %v4833_v1  ;;  %v4927_v0 = vld [vmem:[#allocation6 + $0x38c] ss:$16 sps:$4 sm:$0xff]   ;;  %v4922_v1 = vld [vmem:[#allocation6 + $0x8] ss:$16 sps:$4 sm:$0xff]  }
 0x11f   :  { %2883 = vmatprep.subr.bf16.mxu1 %v4836_v2  ;;  %v4925_v2 = vld [vmem:[#allocation6 + $0x388] ss:$16 sps:$4 sm:$0xff]  }
 0x121   :  { %2841 = vmatpush2.bf16.msra.mxu0 %v4831_v3  ;;  %v4930_v3 = vld [vmem:[#allocation6 + $0x1ec] ss:$16 sps:$4 sm:$0xff]  }
 0x122   :  { %2884 = vmatpush2.bf16.msra.mxu1 %v4834_v4  ;;  %2842 = vmatprep.subr.bf16.mxu0 %v4839_v5  ;;  %v4933_v4 = vld [vmem:[#allocation6 + $0x36c] ss:$16 sps:$4 sm:$0xff]   ;;  %v4928_v5 = vld [vmem:[#allocation6 + $0x1e8] ss:$16 sps:$4 sm:$0xff]  }
 0x123   :  { %2885 = vmatprep.subr.bf16.mxu1 %v4842_v6  ;;  %v4931_v6 = vld [vmem:[#allocation6 + $0x368] ss:$16 sps:$4 sm:$0xff]  }
 0x125   :  { %2843 = vmatpush2.bf16.msra.mxu0 %v4837_v7  ;;  %v4936_v7 = vld [vmem:[#allocation6 + $0x1cc] ss:$16 sps:$4 sm:$0xff]  }
 0x126   :  { %2886 = vmatpush2.bf16.msra.mxu1 %v4840_v8  ;;  %2844 = vmatprep.subr.bf16.mxu0 %v4845_v9  ;;  %v4939_v8 = vld [vmem:[#allocation6 + $0x34c] ss:$16 sps:$4 sm:$0xff]   ;;  %v4934_v9 = vld [vmem:[#allocation6 + $0x1c8] ss:$16 sps:$4 sm:$0xff]  }
 0x127   :  { %2887 = vmatprep.subr.bf16.mxu1 %v4848_v10  ;;  %v4937_v10 = vld [vmem:[#allocation6 + $0x348] ss:$16 sps:$4 sm:$0xff]  }
 0x129   :  { %2845 = vmatpush2.bf16.msra.mxu0 %v4843_v11  ;;  %v4942_v11 = vld [vmem:[#allocation6 + $0x1ac] ss:$16 sps:$4 sm:$0xff]  }
 0x12a   :  { %2888 = vmatpush2.bf16.msra.mxu1 %v4846_v12  ;;  %2986 = vmatprep.subr.bf16.mxu0 %v4860_v14  ;;  %v4945_v12 = vld [vmem:[#allocation6 + $0x32c] ss:$16 sps:$4 sm:$0xff]   ;;  %v4943_v14 = vld [vmem:[#allocation6 + $0x328] ss:$16 sps:$4 sm:$0xff]  }
 0x12b   :  { %2908 = vmatprep.subr.bf16.mxu1 %v4857_v13  ;;  %v4940_v13 = vld [vmem:[#allocation6 + $0x1a8] ss:$16 sps:$4 sm:$0xff]  }
 0x12c   :  { %2847 = vmatmul.mubr.bf16.vlgmr.msra.gmra.mxu0 %v4849_v15  ;;  %v4948_v15 = vld [vmem:[#allocation6 + $0x18c] ss:$16 sps:$4 sm:$0xff]  }
 0x12d   :  { %2890 = vmatmul.mubr.bf16.vlgmr.msra.gmra.mxu1 %v4852_v16  ;;  %2987 = vmatpush1.bf16.msra.mxu0 %v4858_v18  ;;  %v4951_v16 = vld [vmem:[#allocation6 + $0x30c] ss:$16 sps:$4 sm:$0xff]   ;;  %v4949_v18 = vld [vmem:[#allocation6 + $0x308] ss:$16 sps:$4 sm:$0xff]  }
 0x12e   :  { %2909 = vmatpush1.bf16.msra.mxu1 %v4855_v17  ;;  %2988 = vmatprep.subr.bf16.mxu0 %v4866_v20  ;;  %v4946_v17 = vld [vmem:[#allocation6 + $0x188] ss:$16 sps:$4 sm:$0xff]   ;;  %v4957_v20 = vld [vmem:[#allocation6 + $0x6ec] ss:$16 sps:$4 sm:$0xff]  }
 0x12f   :  { %2910 = vmatprep.subr.bf16.mxu1 %v4863_v19  ;;  %2932 = vmatprep.mubr.bf16.mxu1 %v5505_v27  ;;  %v4954_v19 = vld [vmem:[#allocation6 + $0x16c] ss:$16 sps:$4 sm:$0xff]  }
 0x130   :  { %3018 = vmatprep.mubr.bf16.mxu0 %v5284_v25  ;;  %v5286_v25 = vld [vmem:[#allocation3 + $0x8] ss:$52 sps:$4 sm:$0xff]  }
 0x131   :  { %2989 = vmatpush1.bf16.msra.mxu0 %v4864_v22  ;;  %v4955_v22 = vld [vmem:[#allocation6 + $0x6e8] ss:$16 sps:$4 sm:$0xff]  }
 0x132   :  { %2911 = vmatpush1.bf16.msra.mxu1 %v4861_v21  ;;  %2990 = vmatprep.subr.bf16.mxu0 %v4872_v24  ;;  %v4952_v21 = vld [vmem:[#allocation6 + $0x168] ss:$16 sps:$4 sm:$0xff]   ;;  %v4963_v24 = vld [vmem:[#allocation6 + $0x6cc] ss:$16 sps:$4 sm:$0xff]  }
 0x133   :  { %2912 = vmatprep.subr.bf16.mxu1 %v4869_v23  ;;  %v4960_v23 = vld [vmem:[#allocation6 + $0x14c] ss:$16 sps:$4 sm:$0xff]  }
 0x135   :  { %2991 = vmatpush1.bf16.msra.mxu0 %v4870_v28  ;;  %v4961_v28 = vld [vmem:[#allocation6 + $0x6c8] ss:$16 sps:$4 sm:$0xff]  }
 0x136   :  { %2913 = vmatpush1.bf16.msra.mxu1 %v4867_v26  ;;  %2992 = vmatprep.subr.bf16.mxu0 %v4878_v30  ;;  %v4958_v26 = vld [vmem:[#allocation6 + $0x148] ss:$16 sps:$4 sm:$0xff]   ;;  %v4969_v30 = vld [vmem:[#allocation6 + $0x6ac] ss:$16 sps:$4 sm:$0xff]  }
 0x137   :  { %2914 = vmatprep.subr.bf16.mxu1 %v4875_v29  ;;  %v4966_v29 = vld [vmem:[#allocation6 + $0x12c] ss:$16 sps:$4 sm:$0xff]  }
 0x139   :  { %2993 = vmatpush1.bf16.msra.mxu0 %v4876_v32  ;;  %v4964_v32 = vld [vmem:[#allocation6 + $0x128] ss:$16 sps:$4 sm:$0xff]  }
 0x13a   :  { %2915 = vmatpush1.bf16.msra.mxu1 %v4873_v31  ;;  %2994 = vmatprep.subr.bf16.mxu0 %v4885_v34  ;;  %v5287_v31 = vld [vmem:[#allocation3 + $0x1c] ss:$52 sps:$4 sm:$0xff]   ;;  %v4972_v34 = vld [vmem:[#allocation6 + $0x10c] ss:$16 sps:$4 sm:$0xff]  }
 0x13b   :  { %2943 = vmatprep.subr.bf16.mxu1 %v4882_v33  ;;  %v4967_v33 = vld [vmem:[#allocation6 + $0x6a8] ss:$16 sps:$4 sm:$0xff]  }
 0x13d   :  { %4414 = vmatmul.mubr.msk.bf16.vlgmr.msra.gmra.mxu1 %vm2638_vm0, %v4879_v35  ;;  %2995 = vmatpush1.bf16.msra.mxu0 %v4883_v37  ;;  %v4975_v35 = vld [vmem:[#allocation6 + $0x68c] ss:$16 sps:$4 sm:$0xff]   ;;  %v4973_v37 = vld [vmem:[#allocation6 + $0x688] ss:$16 sps:$4 sm:$0xff]  }
 0x13e   :  { %2944 = vmatpush1.bf16.msra.mxu1 %v4880_v36  ;;  %2996 = vmatprep.subr.bf16.mxu0 %v4891_v39  ;;  %v4970_v36 = vld [vmem:[#allocation6 + $0x108] ss:$16 sps:$4 sm:$0xff]   ;;  %v4981_v39 = vld [vmem:[#allocation6 + $0x66c] ss:$16 sps:$4 sm:$0xff]  }
 0x13f   :  { %2945 = vmatprep.subr.bf16.mxu1 %v4888_v38  ;;  %2975 = vmatprep.mubr.bf16.mxu1 %v5285_v44  ;;  %v4978_v38 = vld [vmem:[#allocation6 + $0x4ec] ss:$16 sps:$4 sm:$0xff]  }
 0x140   :  { %v5288_v44 = vld [vmem:[#allocation3] ss:$52 sps:$4 sm:$0xff]  }
 0x141   :  { %2997 = vmatpush1.bf16.msra.mxu0 %v4889_v41  ;;  %v4979_v41 = vld [vmem:[#allocation6 + $0x668] ss:$16 sps:$4 sm:$0xff]  }
 0x142   :  { %2946 = vmatpush1.bf16.msra.mxu1 %v4886_v40  ;;  %2998 = vmatprep.subr.bf16.mxu0 %v4897_v43  ;;  %v4976_v40 = vld [vmem:[#allocation6 + $0x4e8] ss:$16 sps:$4 sm:$0xff]   ;;  %v4987_v43 = vld [vmem:[#allocation6 + $0x64c] ss:$16 sps:$4 sm:$0xff]  }
 0x143   :  { %2947 = vmatprep.subr.bf16.mxu1 %v4894_v42  ;;  %v4984_v42 = vld [vmem:[#allocation6 + $0x4cc] ss:$16 sps:$4 sm:$0xff]  }
 0x145   :  { %2999 = vmatpush1.bf16.msra.mxu0 %v4895_v46  ;;  %v4985_v46 = vld [vmem:[#allocation6 + $0x648] ss:$16 sps:$4 sm:$0xff]  }
 0x146   :  { %2948 = vmatpush1.bf16.msra.mxu1 %v4892_v45  ;;  %3000 = vmatprep.subr.bf16.mxu0 %v4903_v48  ;;  %v4982_v45 = vld [vmem:[#allocation6 + $0x4c8] ss:$16 sps:$4 sm:$0xff]   ;;  %v4993_v48 = vld [vmem:[#allocation6 + $0x62c] ss:$16 sps:$4 sm:$0xff]  }
 0x147   :  { %2949 = vmatprep.subr.bf16.mxu1 %v4900_v47  ;;  %v4990_v47 = vld [vmem:[#allocation6 + $0x4ac] ss:$16 sps:$4 sm:$0xff]  }
 0x149   :  { %3001 = vmatpush1.bf16.msra.mxu0 %v4901_v50  ;;  %v4988_v50 = vld [vmem:[#allocation6 + $0x4a8] ss:$16 sps:$4 sm:$0xff]  }
 0x14a   :  { %2950 = vmatpush1.bf16.msra.mxu1 %v4898_v49  ;;  %3002 = vmatprep.subr.bf16.mxu0 %v4909_v52  ;;  %v5289_v49 = vld [vmem:[#allocation3 + $0x14] ss:$52 sps:$4 sm:$0xff]  }
 0x14b   :  { %2951 = vmatprep.subr.bf16.mxu1 %v4906_v51  ;;  %v4991_v51 = vld [vmem:[#allocation6 + $0x628] ss:$16 sps:$4 sm:$0xff]   ;;  %v4996_v52 = vld [vmem:[#allocation6 + $0x48c] ss:$16 sps:$4 sm:$0xff]  }
 0x14d   :  { %3003 = vmatpush2.bf16.msra.mxu0 %v4907_v54  ;;  %v4994_v54 = vld [vmem:[#allocation6 + $0x488] ss:$16 sps:$4 sm:$0xff]  }
 0x14e   :  { %2952 = vmatpush1.bf16.msra.mxu1 %v4904_v53  ;;  %3004 = vmatprep.subr.bf16.mxu0 %v4915_v56  ;;  %v4999_v53 = vld [vmem:[#allocation6 + $0x60c] ss:$16 sps:$4 sm:$0xff]  }
 0x14f   :  { %2953 = vmatprep.subr.bf16.mxu1 %v4912_v55  ;;  %v4997_v55 = vld [vmem:[#allocation6 + $0x608] ss:$16 sps:$4 sm:$0xff]   ;;  %v5002_v56 = vld [vmem:[#allocation6 + $0x46c] ss:$16 sps:$4 sm:$0xff]  }
 0x151   :  { %3005 = vmatpush2.bf16.msra.mxu0 %v4913_v58  ;;  %v5000_v58 = vld [vmem:[#allocation6 + $0x468] ss:$16 sps:$4 sm:$0xff]  }
 0x152   :  { %2954 = vmatpush1.bf16.msra.mxu1 %v4910_v57  ;;  %3006 = vmatprep.subr.bf16.mxu0 %v4921_v60  ;;  %v5005_v57 = vld [vmem:[#allocation6 + $0x7ec] ss:$16 sps:$4 sm:$0xff]  }
 0x153   :  { %2955 = vmatprep.subr.bf16.mxu1 %v4918_v59  ;;  %v5003_v59 = vld [vmem:[#allocation6 + $0x7e8] ss:$16 sps:$4 sm:$0xff]   ;;  %v5008_v60 = vld [vmem:[#allocation6 + $0x44c] ss:$16 sps:$4 sm:$0xff]  }
 0x155   :  { %3007 = vmatpush2.bf16.msra.mxu0 %v4919_v62  ;;  %v5006_v62 = vld [vmem:[#allocation6 + $0x448] ss:$16 sps:$4 sm:$0xff]  }
 0x156   :  { %2956 = vmatpush1.bf16.msra.mxu1 %v4916_v61  ;;  %3008 = vmatprep.subr.bf16.mxu0 %v4927_v0  ;;  %v5011_v61 = vld [vmem:[#allocation6 + $0x7cc] ss:$16 sps:$4 sm:$0xff]  }
 0x157   :  { %2957 = vmatprep.subr.bf16.mxu1 %v4924_v63  ;;  %v5009_v63 = vld [vmem:[#allocation6 + $0x7c8] ss:$16 sps:$4 sm:$0xff]   ;;  %v5014_v0 = vld [vmem:[#allocation6 + $0x42c] ss:$16 sps:$4 sm:$0xff]  }
 0x159   :  { %3009 = vmatpush2.bf16.msra.mxu0 %v4925_v2  ;;  %v5012_v2 = vld [vmem:[#allocation6 + $0x428] ss:$16 sps:$4 sm:$0xff]  }
 0x15a   :  { %2958 = vmatpush1.bf16.msra.mxu1 %v4922_v1  ;;  %3010 = vmatprep.subr.bf16.mxu0 %v4933_v4  ;;  %v5017_v1 = vld [vmem:[#allocation6 + $0x7ac] ss:$16 sps:$4 sm:$0xff]  }
 0x15b   :  { %2959 = vmatprep.subr.bf16.mxu1 %v4930_v3  ;;  %v5015_v3 = vld [vmem:[#allocation6 + $0x7a8] ss:$16 sps:$4 sm:$0xff]   ;;  %v5020_v4 = vld [vmem:[#allocation6 + $0x40c] ss:$16 sps:$4 sm:$0xff]  }
 0x15d   :  { %3011 = vmatpush2.bf16.msra.mxu0 %v4931_v6  ;;  %v5018_v6 = vld [vmem:[#allocation6 + $0x408] ss:$16 sps:$4 sm:$0xff]  }
 0x15e   :  { %2960 = vmatpush2.bf16.msra.mxu1 %v4928_v5  ;;  %3012 = vmatprep.subr.bf16.mxu0 %v4939_v8  ;;  %v5023_v5 = vld [vmem:[#allocation6 + $0x78c] ss:$16 sps:$4 sm:$0xff]  }
 0x15f   :  { %2961 = vmatprep.subr.bf16.mxu1 %v4936_v7  ;;  %v5021_v7 = vld [vmem:[#allocation6 + $0x788] ss:$16 sps:$4 sm:$0xff]   ;;  %v5026_v8 = vld [vmem:[#allocation6 + $0x5ec] ss:$16 sps:$4 sm:$0xff]  }
 0x161   :  { %3013 = vmatpush2.bf16.msra.mxu0 %v4937_v10  ;;  %v5024_v10 = vld [vmem:[#allocation6 + $0x5e8] ss:$16 sps:$4 sm:$0xff]  }
 0x162   :  { %2962 = vmatpush2.bf16.msra.mxu1 %v4934_v9  ;;  %3014 = vmatprep.subr.bf16.mxu0 %v4945_v12  ;;  %v5029_v9 = vld [vmem:[#allocation6 + $0x76c] ss:$16 sps:$4 sm:$0xff]  }
 0x163   :  { %2963 = vmatprep.subr.bf16.mxu1 %v4942_v11  ;;  %v5027_v11 = vld [vmem:[#allocation6 + $0x768] ss:$16 sps:$4 sm:$0xff]   ;;  %v5032_v12 = vld [vmem:[#allocation6 + $0x5cc] ss:$16 sps:$4 sm:$0xff]  }
 0x165   :  { %3015 = vmatpush2.bf16.msra.mxu0 %v4943_v14  ;;  %v5030_v14 = vld [vmem:[#allocation6 + $0x5c8] ss:$16 sps:$4 sm:$0xff]  }
 0x166   :  { %2964 = vmatpush2.bf16.msra.mxu1 %v4940_v13  ;;  %3016 = vmatprep.subr.bf16.mxu0 %v4951_v16  ;;  %v5035_v13 = vld [vmem:[#allocation6 + $0x74c] ss:$16 sps:$4 sm:$0xff]  }
 0x167   :  { %2965 = vmatprep.subr.bf16.mxu1 %v4948_v15  ;;  %v5033_v15 = vld [vmem:[#allocation6 + $0x748] ss:$16 sps:$4 sm:$0xff]   ;;  %v5038_v16 = vld [vmem:[#allocation6 + $0x5ac] ss:$16 sps:$4 sm:$0xff]  }
 0x169   :  { %3017 = vmatpush2.bf16.msra.mxu0 %v4949_v18  ;;  %v5036_v18 = vld [vmem:[#allocation6 + $0x5a8] ss:$16 sps:$4 sm:$0xff]  }
 0x16a   :  { %2966 = vmatpush2.bf16.msra.mxu1 %v4946_v17  ;;  %3072 = vmatprep.subr.bf16.mxu0 %v4957_v20  ;;  %v5041_v17 = vld [vmem:[#allocation6 + $0x72c] ss:$16 sps:$4 sm:$0xff]  }
 0x16b   :  { %2967 = vmatprep.subr.bf16.mxu1 %v4954_v19  ;;  %v5039_v19 = vld [vmem:[#allocation6 + $0x728] ss:$16 sps:$4 sm:$0xff]   ;;  %v5044_v20 = vld [vmem:[#allocation6 + $0x58c] ss:$16 sps:$4 sm:$0xff]  }
 0x16c   :  { %3019 = vmatmul.mubr.bf16.vlgmr.msra.gmra.mxu0 %v5286_v25  ;;  %v5053_v25 = vld [vmem:[#allocation6 + $0xaec] ss:$16 sps:$4 sm:$0xff]  }
 0x16d   :  { %3073 = vmatpush1.bf16.msra.mxu0 %v4955_v22  ;;  %3104 = vmatprep.mubr.bf16.mxu0 %v5287_v31  ;;  %v5042_v22 = vld [vmem:[#allocation6 + $0x588] ss:$16 sps:$4 sm:$0xff]   ;;  %v5290_v31 = vld [vmem:[#allocation3 + $0x18] ss:$52 sps:$4 sm:$0xff]  }
 0x16e   :  { %2968 = vmatpush2.bf16.msra.mxu1 %v4952_v21  ;;  %3074 = vmatprep.subr.bf16.mxu0 %v4963_v24  ;;  %v5047_v21 = vld [vmem:[#allocation6 + $0x70c] ss:$16 sps:$4 sm:$0xff]  }
 0x16f   :  { %2969 = vmatprep.subr.bf16.mxu1 %v4960_v23  ;;  %v5045_v23 = vld [vmem:[#allocation6 + $0x708] ss:$16 sps:$4 sm:$0xff]   ;;  %v5050_v24 = vld [vmem:[#allocation6 + $0x56c] ss:$16 sps:$4 sm:$0xff]  }
 0x171   :  { %3075 = vmatpush1.bf16.msra.mxu0 %v4961_v28  ;;  %v5051_v28 = vld [vmem:[#allocation6 + $0xae8] ss:$16 sps:$4 sm:$0xff]  }
 0x172   :  { %2970 = vmatpush2.bf16.msra.mxu1 %v4958_v26  ;;  %3076 = vmatprep.subr.bf16.mxu0 %v4969_v30  ;;  %v5048_v26 = vld [vmem:[#allocation6 + $0x568] ss:$16 sps:$4 sm:$0xff]   ;;  %v5059_v30 = vld [vmem:[#allocation6 + $0xacc] ss:$16 sps:$4 sm:$0xff]  }
 0x173   :  { %2971 = vmatprep.subr.bf16.mxu1 %v4966_v29  ;;  %v5056_v29 = vld [vmem:[#allocation6 + $0x54c] ss:$16 sps:$4 sm:$0xff]  }
 0x175   :  { %3077 = vmatpush1.bf16.msra.mxu0 %v4967_v33  ;;  %v5057_v33 = vld [vmem:[#allocation6 + $0xac8] ss:$16 sps:$4 sm:$0xff]  }
 0x176   :  { %2972 = vmatpush2.bf16.msra.mxu1 %v4964_v32  ;;  %3078 = vmatprep.subr.bf16.mxu0 %v4975_v35  ;;  %v5054_v32 = vld [vmem:[#allocation6 + $0x548] ss:$16 sps:$4 sm:$0xff]   ;;  %v5065_v35 = vld [vmem:[#allocation6 + $0xaac] ss:$16 sps:$4 sm:$0xff]  }
 0x177   :  { %2973 = vmatprep.subr.bf16.mxu1 %v4972_v34  ;;  %v5062_v34 = vld [vmem:[#allocation6 + $0x52c] ss:$16 sps:$4 sm:$0xff]  }
 0x179   :  { %3079 = vmatpush1.bf16.msra.mxu0 %v4973_v37  ;;  %v5060_v37 = vld [vmem:[#allocation6 + $0x528] ss:$16 sps:$4 sm:$0xff]  }
 0x17a   :  { %2974 = vmatpush2.bf16.msra.mxu1 %v4970_v36  ;;  %3080 = vmatprep.subr.bf16.mxu0 %v4981_v39  ;;  %v5291_v36 = vld [vmem:[#allocation3 + $0x2c] ss:$52 sps:$4 sm:$0xff]   ;;  %v5068_v39 = vld [vmem:[#allocation6 + $0x50c] ss:$16 sps:$4 sm:$0xff]  }
 0x17b   :  { %3029 = vmatprep.subr.bf16.mxu1 %v4978_v38  ;;  %v5063_v38 = vld [vmem:[#allocation6 + $0xaa8] ss:$16 sps:$4 sm:$0xff]  }
 0x17d   :  { %2976 = vmatmul.mubr.bf16.vlgmr.msra.gmra.mxu1 %v5288_v44  ;;  %3081 = vmatpush1.bf16.msra.mxu0 %v4979_v41  ;;  %v5066_v41 = vld [vmem:[#allocation6 + $0x508] ss:$16 sps:$4 sm:$0xff]   ;;  %v5077_v44 = vld [vmem:[#allocation6 + $0xa6c] ss:$16 sps:$4 sm:$0xff]  }
 0x17e   :  { %3030 = vmatpush1.bf16.msra.mxu1 %v4976_v40  ;;  %3082 = vmatprep.subr.bf16.mxu0 %v4987_v43  ;;  %v5071_v40 = vld [vmem:[#allocation6 + $0xa8c] ss:$16 sps:$4 sm:$0xff]  }
 0x17f   :  { %3031 = vmatprep.subr.bf16.mxu1 %v4984_v42  ;;  %3061 = vmatprep.mubr.bf16.mxu1 %v5289_v49  ;;  %v5069_v42 = vld [vmem:[#allocation6 + $0xa88] ss:$16 sps:$4 sm:$0xff]   ;;  %v5074_v43 = vld [vmem:[#allocation6 + $0x8ec] ss:$16 sps:$4 sm:$0xff]  }
 0x180   :  { %v5292_v49 = vld [vmem:[#allocation3 + $0x10] ss:$52 sps:$4 sm:$0xff]  }
 0x181   :  { %3083 = vmatpush1.bf16.msra.mxu0 %v4985_v46  ;;  %v5075_v46 = vld [vmem:[#allocation6 + $0xa68] ss:$16 sps:$4 sm:$0xff]  }
 0x182   :  { %3032 = vmatpush1.bf16.msra.mxu1 %v4982_v45  ;;  %3084 = vmatprep.subr.bf16.mxu0 %v4993_v48  ;;  %v5072_v45 = vld [vmem:[#allocation6 + $0x8e8] ss:$16 sps:$4 sm:$0xff]   ;;  %v5083_v48 = vld [vmem:[#allocation6 + $0xa4c] ss:$16 sps:$4 sm:$0xff]  }
 0x183   :  { %3033 = vmatprep.subr.bf16.mxu1 %v4990_v47  ;;  %v5080_v47 = vld [vmem:[#allocation6 + $0x8cc] ss:$16 sps:$4 sm:$0xff]  }
 0x185   :  { %3085 = vmatpush1.bf16.msra.mxu0 %v4991_v51  ;;  %v5081_v51 = vld [vmem:[#allocation6 + $0xa48] ss:$16 sps:$4 sm:$0xff]  }
 0x186   :  { %3034 = vmatpush1.bf16.msra.mxu1 %v4988_v50  ;;  %3086 = vmatprep.subr.bf16.mxu0 %v4999_v53  ;;  %v5078_v50 = vld [vmem:[#allocation6 + $0x8c8] ss:$16 sps:$4 sm:$0xff]   ;;  %v5089_v53 = vld [vmem:[#allocation6 + $0xa2c] ss:$16 sps:$4 sm:$0xff]  }
 0x187   :  { %3035 = vmatprep.subr.bf16.mxu1 %v4996_v52  ;;  %v5086_v52 = vld [vmem:[#allocation6 + $0x8ac] ss:$16 sps:$4 sm:$0xff]  }
 0x189   :  { %3087 = vmatpush1.bf16.msra.mxu0 %v4997_v55  ;;  %v5084_v55 = vld [vmem:[#allocation6 + $0x8a8] ss:$16 sps:$4 sm:$0xff]  }
 0x18a   :  { %3036 = vmatpush1.bf16.msra.mxu1 %v4994_v54  ;;  %3088 = vmatprep.subr.bf16.mxu0 %v5005_v57  ;;  %v5293_v54 = vld [vmem:[#allocation3 + $0x24] ss:$52 sps:$4 sm:$0xff]  }
 0x18b   :  { %3037 = vmatprep.subr.bf16.mxu1 %v5002_v56  ;;  %v5087_v56 = vld [vmem:[#allocation6 + $0xa28] ss:$16 sps:$4 sm:$0xff]   ;;  %v5092_v57 = vld [vmem:[#allocation6 + $0x88c] ss:$16 sps:$4 sm:$0xff]  }
 0x18d   :  { %3089 = vmatpush2.bf16.msra.mxu0 %v5003_v59  ;;  %v5090_v59 = vld [vmem:[#allocation6 + $0x888] ss:$16 sps:$4 sm:$0xff]  }
 0x18e   :  { %3038 = vmatpush1.bf16.msra.mxu1 %v5000_v58  ;;  %3090 = vmatprep.subr.bf16.mxu0 %v5011_v61  ;;  %v5095_v58 = vld [vmem:[#allocation6 + $0xa0c] ss:$16 sps:$4 sm:$0xff]  }
 0x18f   :  { %3039 = vmatprep.subr.bf16.mxu1 %v5008_v60  ;;  %v5093_v60 = vld [vmem:[#allocation6 + $0xa08] ss:$16 sps:$4 sm:$0xff]   ;;  %v5098_v61 = vld [vmem:[#allocation6 + $0x86c] ss:$16 sps:$4 sm:$0xff]  }
 0x191   :  { %3091 = vmatpush2.bf16.msra.mxu0 %v5009_v63  ;;  %v5096_v63 = vld [vmem:[#allocation6 + $0x868] ss:$16 sps:$4 sm:$0xff]  }
 0x192   :  { %3040 = vmatpush1.bf16.msra.mxu1 %v5006_v62  ;;  %3092 = vmatprep.subr.bf16.mxu0 %v5017_v1  ;;  %v5101_v62 = vld [vmem:[#allocation6 + $0xbec] ss:$16 sps:$4 sm:$0xff]  }
 0x193   :  { %3041 = vmatprep.subr.bf16.mxu1 %v5014_v0  ;;  %v5099_v0 = vld [vmem:[#allocation6 + $0xbe8] ss:$16 sps:$4 sm:$0xff]   ;;  %v5104_v1 = vld [vmem:[#allocation6 + $0x84c] ss:$16 sps:$4 sm:$0xff]  }
 0x195   :  { %3093 = vmatpush2.bf16.msra.mxu0 %v5015_v3  ;;  %v5102_v3 = vld [vmem:[#allocation6 + $0x848] ss:$16 sps:$4 sm:$0xff]  }
 0x196   :  { %3042 = vmatpush1.bf16.msra.mxu1 %v5012_v2  ;;  %3094 = vmatprep.subr.bf16.mxu0 %v5023_v5  ;;  %v5107_v2 = vld [vmem:[#allocation6 + $0xbcc] ss:$16 sps:$4 sm:$0xff]  }
 0x197   :  { %3043 = vmatprep.subr.bf16.mxu1 %v5020_v4  ;;  %v5105_v4 = vld [vmem:[#allocation6 + $0xbc8] ss:$16 sps:$4 sm:$0xff]   ;;  %v5110_v5 = vld [vmem:[#allocation6 + $0x82c] ss:$16 sps:$4 sm:$0xff]  }
 0x199   :  { %3095 = vmatpush2.bf16.msra.mxu0 %v5021_v7  ;;  %v5108_v7 = vld [vmem:[#allocation6 + $0x828] ss:$16 sps:$4 sm:$0xff]  }
 0x19a   :  { %3044 = vmatpush1.bf16.msra.mxu1 %v5018_v6  ;;  %3096 = vmatprep.subr.bf16.mxu0 %v5029_v9  ;;  %v5113_v6 = vld [vmem:[#allocation6 + $0xbac] ss:$16 sps:$4 sm:$0xff]   ;;  %v5589_v9 = vpop.f32.mrf.mxu0 }
 0x19b   :  { %3045 = vmatprep.subr.bf16.mxu1 %v5026_v8  ;;  %v5111_v8 = vld [vmem:[#allocation6 + $0xba8] ss:$16 sps:$4 sm:$0xff]  }
 0x19d   :  { %3097 = vmatpush2.bf16.msra.mxu0 %v5027_v11  ;;  %v5116_v11 = vld [vmem:[#allocation6 + $0x80c] ss:$16 sps:$4 sm:$0xff]  }
 0x19e   :  { %3046 = vmatpush2.bf16.msra.mxu1 %v5024_v10  ;;  %3098 = vmatprep.subr.bf16.mxu0 %v5035_v13  ;;  %v5591_v10 = vpop.f32.mrf.mxu1  ;;  %v5114_v13 = vld [vmem:[#allocation6 + $0x808] ss:$16 sps:$4 sm:$0xff]  }
 0x19f   :  { %3047 = vmatprep.subr.bf16.mxu1 %v5032_v12  ;;  %v5119_v12 = vld [vmem:[#allocation6 + $0xb8c] ss:$16 sps:$4 sm:$0xff]  }
 0x1a1   :  { %3099 = vmatpush2.bf16.msra.mxu0 %v5033_v15  ;;  %v5593_v15 = vpop.f32.mrf.mxu0 }
 0x1a2   :  { %3048 = vmatpush2.bf16.msra.mxu1 %v5030_v14  ;;  %3100 = vmatprep.subr.bf16.mxu0 %v5041_v17  ;;  %v5117_v14 = vld [vmem:[#allocation6 + $0xb88] ss:$16 sps:$4 sm:$0xff]   ;;  %v5122_v17 = vld [vmem:[#allocation6 + $0x9ec] ss:$16 sps:$4 sm:$0xff]  }
 0x1a3   :  { %3049 = vmatprep.subr.bf16.mxu1 %v5038_v16  ;;  %v5595_v16 = vpop.f32.mrf.mxu1 }
 0x1a5   :  { %3101 = vmatpush2.bf16.msra.mxu0 %v5039_v19  ;;  %v5120_v19 = vld [vmem:[#allocation6 + $0x9e8] ss:$16 sps:$4 sm:$0xff]  }
 0x1a6   :  { %3050 = vmatpush2.bf16.msra.mxu1 %v5036_v18  ;;  %3102 = vmatprep.subr.bf16.mxu0 %v5047_v21  ;;  %v5125_v18 = vld [vmem:[#allocation6 + $0xb6c] ss:$16 sps:$4 sm:$0xff]   ;;  %v5597_v21 = vpop.f32.mrf.mxu0 }
 0x1a7   :  { %3051 = vmatprep.subr.bf16.mxu1 %v5044_v20  ;;  %v5123_v20 = vld [vmem:[#allocation6 + $0xb68] ss:$16 sps:$4 sm:$0xff]  }
 0x1a9   :  { %3103 = vmatpush2.bf16.msra.mxu0 %v5045_v23  ;;  %v5128_v23 = vld [vmem:[#allocation6 + $0x9cc] ss:$16 sps:$4 sm:$0xff]  }
 0x1aa   :  { %3052 = vmatpush2.bf16.msra.mxu1 %v5042_v22  ;;  %3158 = vmatprep.subr.bf16.mxu0 %v5053_v25  ;;  %v5599_v22 = vpop.f32.mrf.mxu1  ;;  %v5126_v25 = vld [vmem:[#allocation6 + $0x9c8] ss:$16 sps:$4 sm:$0xff]  }
 0x1ab   :  { %3053 = vmatprep.subr.bf16.mxu1 %v5050_v24  ;;  %v5131_v24 = vld [vmem:[#allocation6 + $0xb4c] ss:$16 sps:$4 sm:$0xff]  }
 0x1ac   :  { %3105 = vmatmul.mubr.bf16.vlgmr.msra.gmra.mxu0 %v5290_v31  ;;  %v5137_v31 = vld [vmem:[#allocation6 + $0xb2c] ss:$16 sps:$4 sm:$0xff]  }
 0x1ad   :  { %3159 = vmatpush1.bf16.msra.mxu0 %v5051_v28  ;;  %3190 = vmatprep.mubr.bf16.mxu0 %v5291_v36  ;;  %v2682_v28 = vpop.f32.mrf.mxu0  ;;  %v5135_v36 = vld [vmem:[#allocation6 + $0xb28] ss:$16 sps:$4 sm:$0xff]  }
 0x1ae   :  { %3054 = vmatpush2.bf16.msra.mxu1 %v5048_v26  ;;  %3160 = vmatprep.subr.bf16.mxu0 %v5059_v30  ;;  %v5129_v26 = vld [vmem:[#allocation6 + $0xb48] ss:$16 sps:$4 sm:$0xff]   ;;  %v5134_v30 = vld [vmem:[#allocation6 + $0x9ac] ss:$16 sps:$4 sm:$0xff]  }
 0x1af   :  { %3055 = vmatprep.subr.bf16.mxu1 %v5056_v29  ;;  %v5601_v29 = vpop.f32.mrf.mxu1 }
 0x1b1   :  { %3161 = vmatpush1.bf16.msra.mxu0 %v5057_v33  ;;  %v5605_v33 = vpop.f32.mrf.mxu1 }
 0x1b2   :  { %3056 = vmatpush2.bf16.msra.mxu1 %v5054_v32  ;;  %3162 = vmatprep.subr.bf16.mxu0 %v5065_v35  ;;  %v5603_v32 = vpop.f32.mrf.mxu0  ;;  %v5132_v35 = vld [vmem:[#allocation6 + $0x9a8] ss:$16 sps:$4 sm:$0xff]  }
 0x1b3   :  { %3057 = vmatprep.subr.bf16.mxu1 %v5062_v34  ;;  %v553_v34 = vlaneseq }
 0x1b5   :  { %3163 = vmatpush1.bf16.msra.mxu0 %v5063_v38  ;;  %v5143_v38 = vld [vmem:[#allocation6 + $0xb0c] ss:$16 sps:$4 sm:$0xff]  }
 0x1b6   :  { %3058 = vmatpush2.bf16.msra.mxu1 %v5060_v37  ;;  %3164 = vmatprep.subr.bf16.mxu0 %v5071_v40  ;;  %v5140_v37 = vld [vmem:[#allocation6 + $0x98c] ss:$16 sps:$4 sm:$0xff]   ;;  %v5607_v40 = vpop.f32.mrf.mxu1 }
 0x1b7   :  { %3059 = vmatprep.subr.bf16.mxu1 %v5068_v39  ;;  %v2764_v39 = vpop.f32.mrf.mxu0 }
 0x1b9   :  { %3165 = vmatpush1.bf16.msra.mxu0 %v5069_v42  ;;  %v5138_v42 = vld [vmem:[#allocation6 + $0x988] ss:$16 sps:$4 sm:$0xff]  }
 0x1ba   :  { %3060 = vmatpush2.bf16.msra.mxu1 %v5066_v41  ;;  %3166 = vmatprep.subr.bf16.mxu0 %v5077_v44  ;;  %v5609_v41 = vshrl.u32 %v553_v34, 7  ;;  %v5146_v44 = vld [vmem:[#allocation6 + $0x96c] ss:$16 sps:$4 sm:$0xff]  }
 0x1bb   :  { %3115 = vmatprep.subr.bf16.mxu1 %v5074_v43  ;;  %v5141_v43 = vld [vmem:[#allocation6 + $0xb08] ss:$16 sps:$4 sm:$0xff]  }
 0x1bd   :  { %3062 = vmatmul.mubr.bf16.vlgmr.msra.gmra.mxu1 %v5292_v49  ;;  %3167 = vmatpush1.bf16.msra.mxu0 %v5075_v46  ;;  %v559_v46 = vsub.s32 1, %v5609_v41  ;;  %v5144_v49 = vld [vmem:[#allocation6 + $0x968] ss:$16 sps:$4 sm:$0xff]  }
 0x1be   :  { %3116 = vmatpush1.bf16.msra.mxu1 %v5072_v45  ;;  %3168 = vmatprep.subr.bf16.mxu0 %v5083_v48  ;;  %v5149_v45 = vld [vmem:[#allocation9 + $0x74] ss:$8 sps:$4 sm:$0xff]   ;;  %v5614_v48 = vpop.f32.mrf.mxu1 }
 0x1bf   :  { %3117 = vmatprep.subr.bf16.mxu1 %v5080_v47  ;;  %3147 = vmatprep.mubr.bf16.mxu1 %v5293_v54  ;;  %v5612_v47 = vpop.f32.mrf.mxu0 }
 0x1c1   :  { %3169 = vmatpush1.bf16.msra.mxu0 %v5081_v51  ;;  %v5616_v51 = vld [vmem:[#allocation8] sm:$0xf] }
 0x1c2   :  { %3118 = vmatpush1.bf16.msra.mxu1 %v5078_v50  ;;  %3170 = vmatprep.subr.bf16.mxu0 %v5089_v53  ;;  %v5147_v50 = vld [vmem:[#allocation9 + $0x70] ss:$8 sps:$4 sm:$0xff]   ;;  %v5155_v53 = vld [vmem:[#allocation9 + $0x64] ss:$8 sps:$4 sm:$0xff]   ;;  %v560_v54 = vrot.slane %v5616_v51, %v559_v46 }
 0x1c3   :  { %3119 = vmatprep.subr.bf16.mxu1 %v5086_v52  ;;  %v5152_v52 = vld [vmem:[#allocation6 + $0x94c] ss:$16 sps:$4 sm:$0xff]  }
 0x1c5   :  { %3171 = vmatpush1.bf16.msra.mxu0 %v5087_v56  ;;  %v2811_v56 = vpop.f32.mrf.mxu1 }
 0x1c6   :  { %3120 = vmatpush1.bf16.msra.mxu1 %v5084_v55  ;;  %3172 = vmatprep.subr.bf16.mxu0 %v5095_v58  ;;  %v2768_v55 = vpop.f32.mrf.mxu0  ;;  %v5150_v58 = vld [vmem:[#allocation6 + $0x948] ss:$16 sps:$4 sm:$0xff]  }
 0x1c7   :  { %3121 = vmatprep.subr.bf16.mxu1 %v5092_v57  ;;  %v5294_v57 = vld [vmem:[#allocation3 + $0x28] ss:$52 sps:$4 sm:$0xff]  }
 0x1c9   :  { %3173 = vmatpush1.bf16.msra.mxu0 %v5093_v60 }
 0x1ca   :  { %3122 = vmatpush1.bf16.msra.mxu1 %v5090_v59  ;;  %3174 = vmatprep.subr.bf16.mxu0 %v5101_v62  ;;  %v5153_v59 = vld [vmem:[#allocation9 + $0x60] ss:$8 sps:$4 sm:$0xff]  }
 0x1cb   :  { %3123 = vmatprep.subr.bf16.mxu1 %v5098_v61  ;;  %v5158_v62 = vld [vmem:[#allocation6 + $0x92c] ss:$16 sps:$4 sm:$0xff]  }
 0x1cd   :  { %3175 = vmatpush2.bf16.msra.mxu0 %v5099_v0  ;;  %v2679_v0 = vadd.f32 %v5593_v15, %v560_v54 }
 0x1ce   :  { %3124 = vmatpush1.bf16.msra.mxu1 %v5096_v63  ;;  %3176 = vmatprep.subr.bf16.mxu0 %v5107_v2  ;;  %v5161_v63 = vld [vmem:[#allocation9 + $0x54] ss:$8 sps:$4 sm:$0xff]  }
 0x1cf   :  { %3125 = vmatprep.subr.bf16.mxu1 %v5104_v1  ;;  %v2683_v1 = vadd.f32 %v2682_v28, %v560_v54  ;;  %v5156_v2 = vld [vmem:[#allocation6 + $0x928] ss:$16 sps:$4 sm:$0xff]   ;;  %v5176_v28 = vld [vmem:[#allocation6 + $0xc4c] ss:$16 sps:$4 sm:$0xff]  }
 0x1d0   :  { %v5188_v54 = vld [vmem:[#allocation6 + $0xc0c] ss:$16 sps:$4 sm:$0xff]  }
 0x1d1   :  { %3177 = vmatpush2.bf16.msra.mxu0 %v5105_v4 }
 0x1d2   :  { %3126 = vmatpush1.bf16.msra.mxu1 %v5102_v3  ;;  %3178 = vmatprep.subr.bf16.mxu0 %v5113_v6  ;;  %v5159_v3 = vld [vmem:[#allocation9 + $0x50] ss:$8 sps:$4 sm:$0xff]  }
 0x1d3   :  { %3127 = vmatprep.subr.bf16.mxu1 %v5110_v5  ;;  %v5164_v6 = vld [vmem:[#allocation6 + $0x90c] ss:$16 sps:$4 sm:$0xff]  }
 0x1d5   :  { %3179 = vmatpush2.bf16.msra.mxu0 %v5111_v8  ;;  %v2722_v8 = vadd.f32 %v5595_v16, %v2679_v0  ;;  %v5168_v16 = vld [vmem:[#allocation6 + $0xc68] ss:$16 sps:$4 sm:$0xff]  }
 0x1d6   :  { %3128 = vmatpush1.bf16.msra.mxu1 %v5108_v7  ;;  %3180 = vmatprep.subr.bf16.mxu0 %v5119_v12  ;;  %v5167_v7 = vld [vmem:[#allocation9 + $0x44] ss:$8 sps:$4 sm:$0xff]   ;;  %v5218_v0 = vld [vmem:[#allocation9 + $0x174] ss:$8 sps:$4 sm:$0xff]  }
 0x1d7   :  { %3129 = vmatprep.subr.bf16.mxu1 %v5116_v11  ;;  %v2726_v11 = vadd.f32 %v5601_v29, %v2683_v1  ;;  %v2765_v12 = vadd.f32 %v2764_v39, %v2722_v8  ;;  %v5179_v29 = vld [vmem:[#allocation9 + $0x24] ss:$8 sps:$4 sm:$0xff]   ;;  %v5192_v1 = vld [vmem:[#allocation9 + $0xf0] ss:$8 sps:$4 sm:$0xff]   ;;  %v5219_v8 = vld [vmem:[#allocation9 + $0x160] ss:$8 sps:$4 sm:$0xff]  }
 0x1d9   :  { %3181 = vmatpush2.bf16.msra.mxu0 %v5117_v14  ;;  %v5165_v14 = vld [vmem:[#allocation9 + $0x40] ss:$8 sps:$4 sm:$0xff]  }
 0x1da   :  { %3130 = vmatpush1.bf16.msra.mxu1 %v5114_v13  ;;  %3182 = vmatprep.subr.bf16.mxu0 %v5125_v18  ;;  %v5162_v13 = vld [vmem:[#allocation6 + $0x908] ss:$16 sps:$4 sm:$0xff]   ;;  %v5170_v18 = vld [vmem:[#allocation6 + $0xc6c] ss:$16 sps:$4 sm:$0xff]  }
 0x1db   :  { %3131 = vmatprep.subr.bf16.mxu1 %v5122_v17 }
 0x1dd   :  { %3183 = vmatpush2.bf16.msra.mxu0 %v5123_v20  ;;  %v2769_v20 = vadd.f32 %v2768_v55, %v2726_v11  ;;  %v5191_v55 = vld [vmem:[#allocation9 + $0x4] ss:$8 sps:$4 sm:$0xff]  }
 0x1de   :  { %3132 = vmatpush2.bf16.msra.mxu1 %v5120_v19  ;;  %3184 = vmatprep.subr.bf16.mxu0 %v5131_v24  ;;  %v5173_v19 = vld [vmem:[#allocation9 + $0x34] ss:$8 sps:$4 sm:$0xff]   ;;  %v5171_v24 = vld [vmem:[#allocation9 + $0x30] ss:$8 sps:$4 sm:$0xff]  }
 0x1df   :  { %3133 = vmatprep.subr.bf16.mxu1 %v5128_v23  ;;  %v2808_v23 = vadd.f32 %v5607_v40, %v2765_v12  ;;  %v5182_v40 = vld [vmem:[#allocation6 + $0xc2c] ss:$16 sps:$4 sm:$0xff]   ;;  %v5200_v12 = vld [vmem:[#allocation9 + $0xd4] ss:$8 sps:$4 sm:$0xff]  }
 0x1e1   :  { %3185 = vmatpush2.bf16.msra.mxu0 %v5129_v26 }
 0x1e2   :  { %3134 = vmatpush2.bf16.msra.mxu1 %v5126_v25  ;;  %3186 = vmatprep.subr.bf16.mxu0 %v5137_v31 }
 0x1e3   :  { %3135 = vmatprep.subr.bf16.mxu1 %v5134_v30  ;;  %v2812_v30 = vadd.f32 %v2811_v56, %v2769_v20 }
 0x1e5   :  { %3187 = vmatpush2.bf16.msra.mxu0 %v5135_v36 }
 0x1e6   :  { %3136 = vmatpush2.bf16.msra.mxu1 %v5132_v35  ;;  %3188 = vmatprep.subr.bf16.mxu0 %v5143_v38  ;;  %v5295_v35 = vld [vmem:[#allocation3 + $0x20] ss:$52 sps:$4 sm:$0xff]  }
 0x1e7   :  { %3137 = vmatprep.subr.bf16.mxu1 %v5140_v37  ;;  %v5174_v37 = vld [vmem:[#allocation6 + $0xc48] ss:$16 sps:$4 sm:$0xff]   ;;  %v5177_v38 = vld [vmem:[#allocation9 + $0x20] ss:$8 sps:$4 sm:$0xff]  }
 0x1e9   :  { %3189 = vmatpush2.bf16.msra.mxu0 %v5141_v43 }
 0x1ea   :  { %3138 = vmatpush2.bf16.msra.mxu1 %v5138_v42  ;;  %3652 = vmatprep.subr.bf16.mxu0 %v5149_v45  ;;  %v5185_v42 = vld [vmem:[#allocation9 + $0x14] ss:$8 sps:$4 sm:$0xff]  }
 0x1eb   :  { %3139 = vmatprep.subr.bf16.mxu1 %v5146_v44 }
 0x1ec   :  { %3191 = vmatmul.mubr.bf16.vlgmr.msra.gmra.mxu0 %v5294_v57  ;;  %v5621_v60 = vpop.f32.mrf.mxu0 }
 0x1ed   :  { %3653 = vmatpush1.bf16.msra.mxu0 %v5147_v50  ;;  %v5623_v61 = vpop.f32.mrf.mxu1  ;;  %v5180_v50 = vld [vmem:[#allocation6 + $0xc28] ss:$16 sps:$4 sm:$0xff]  }
 0x1ee   :  { %3140 = vmatpush2.bf16.msra.mxu1 %v5144_v49  ;;  %3654 = vmatprep.subr.bf16.mxu0 %v5155_v53  ;;  %v2850_v4 = vpop.f32.mrf.mxu0 }
 0x1ef   :  { %3141 = vmatprep.subr.bf16.mxu1 %v5152_v52  ;;  %v2893_v5 = vpop.f32.mrf.mxu1  ;;  %v2851_v31 = vadd.f32 %v2850_v4, %v2808_v23  ;;  %v5183_v52 = vld [vmem:[#allocation9 + $0x10] ss:$8 sps:$4 sm:$0xff]   ;;  %v5197_v4 = vld [vmem:[#allocation9 + $0xe4] ss:$8 sps:$4 sm:$0xff]  }
 0x1f0   :  { %v5628_v15 = vpop.f32.mrf.mxu0  ;;  %v5203_v23 = vld [vmem:[#allocation9 + $0xc4] ss:$8 sps:$4 sm:$0xff]  }
 0x1f1   :  { %3655 = vmatpush1.bf16.msra.mxu0 %v5153_v59  ;;  %v5630_v17 = vpop.f32.mrf.mxu1  ;;  %v2894_v43 = vadd.f32 %v2893_v5, %v2851_v31  ;;  %v5186_v59 = vld [vmem:[#allocation6 + $0xc08] ss:$16 sps:$4 sm:$0xff]   ;;  %v5204_v31 = vld [vmem:[#allocation9 + $0xb0] ss:$8 sps:$4 sm:$0xff]  }
 0x1f2   :  { %3142 = vmatpush2.bf16.msra.mxu1 %v5150_v58  ;;  %3656 = vmatprep.subr.bf16.mxu0 %v5161_v63  ;;  %v2854_v25 = vpop.f32.mrf.mxu0  ;;  %v5221_v5 = vld [vmem:[#allocation9 + $0x164] ss:$8 sps:$4 sm:$0xff]  }
 0x1f3   :  { %3143 = vmatprep.subr.bf16.mxu1 %v5158_v62  ;;  %v2897_v26 = vpop.f32.mrf.mxu1  ;;  %v2855_v36 = vadd.f32 %v2854_v25, %v2812_v30  ;;  %v5194_v62 = vld [vmem:[#allocation9 + $0xf4] ss:$8 sps:$4 sm:$0xff]   ;;  %v5201_v25 = vld [vmem:[#allocation9 + $0xc0] ss:$8 sps:$4 sm:$0xff]  }
 0x1f4   :  { %v5230_v30 = vld [vmem:[#allocation9 + $0x134] ss:$8 sps:$4 sm:$0xff]  }
 0x1f5   :  { %3657 = vmatpush1.bf16.msra.mxu0 %v5159_v3  ;;  %v2898_v45 = vadd.f32 %v2897_v26, %v2855_v36  ;;  %v5639_v3 = vsub.s32 0, %v5609_v41  ;;  %v5225_v26 = vld [vmem:[#allocation9 + $0x140] ss:$8 sps:$4 sm:$0xff]   ;;  %v5209_v36 = vld [vmem:[#allocation9 + $0xa4] ss:$8 sps:$4 sm:$0xff]  }
 0x1f6   :  { %3144 = vmatpush2.bf16.msra.mxu1 %v5156_v2  ;;  %3658 = vmatprep.subr.bf16.mxu0 %v5167_v7  ;;  %v5216_v2 = vld [vmem:[#allocation9 + $0x170] ss:$8 sps:$4 sm:$0xff]   ;;  %v5195_v7 = vld [vmem:[#allocation9 + $0xe0] ss:$8 sps:$4 sm:$0xff]  }
 0x1f7   :  { %3145 = vmatprep.subr.bf16.mxu1 %v5164_v6  ;;  %v5296_v6 = vld [vmem:[#allocation3 + $0x30] ss:$52 sps:$4 sm:$0xff]   ;;  %v556_v11 = vrot.slane %v5616_v51, %v5639_v3 }
 0x1f9   :  { %3659 = vmatpush1.bf16.msra.mxu0 %v5165_v14  ;;  %v2681_v14 = vadd.f32 %v5597_v21, %v556_v11  ;;  %v2677_v20 = vadd.f32 %v5589_v9, %v556_v11  ;;  %v5266_v11 = vld [vmem:[#allocation12 + $0x70] sm:$0xff]  }
 0x1fa   :  { %3146 = vmatpush2.bf16.msra.mxu1 %v5162_v13  ;;  %3660 = vmatprep.subr.bf16.mxu0 %v5173_v19  ;;  %v5224_v13 = vld [vmem:[#allocation9 + $0x154] ss:$8 sps:$4 sm:$0xff]   ;;  %v5222_v19 = vld [vmem:[#allocation9 + $0x150] ss:$8 sps:$4 sm:$0xff]  }
 0x1fb   :  { %3209 = vmatprep.subr.bf16.mxu1 %v5170_v18  ;;  %v5198_v18 = vld [vmem:[#allocation9 + $0xd0] ss:$8 sps:$4 sm:$0xff]  }
 0x1fd   :  { %v5633_v34 = vpop.f32.mrf.mxu1  ;;  %3148 = vmatmul.mubr.bf16.vlgmr.msra.gmra.mxu1 %v5295_v35  ;;  %3661 = vmatpush1.bf16.msra.mxu0 %v5171_v24  ;;  %v2724_v24 = vadd.f32 %v5599_v22, %v2681_v14  ;;  %v5228_v35 = vld [vmem:[#allocation9 + $0x130] ss:$8 sps:$4 sm:$0xff]  }
 0x1fe   :  { %3210 = vmatpush1.bf16.msra.mxu1 %v5168_v16  ;;  %3662 = vmatprep.subr.bf16.mxu0 %v5179_v29  ;;  %v5227_v16 = vld [vmem:[#allocation9 + $0x144] ss:$8 sps:$4 sm:$0xff]   ;;  %v5206_v29 = vld [vmem:[#allocation9 + $0xb4] ss:$8 sps:$4 sm:$0xff]  }
 0x1ff   :  { %v2936_v39 = vpop.f32.mrf.mxu1  ;;  %3211 = vmatprep.subr.bf16.mxu1 %v5176_v28  ;;  %3233 = vmatprep.mubr.bf16.mxu1 %v5505_v27  ;;  %v5189_v27 = vld [vmem:[#allocation9] ss:$8 sps:$4 sm:$0xff]   ;;  %v2720_v28 = vadd.f32 %v5591_v10, %v2677_v20  ;;  %v2767_v21 = vadd.f32 %v5612_v47, %v2724_v24 }
 0x200   :  { %v2937_v49 = vadd.f32 %v2936_v39, %v2894_v43  ;;  %v5231_v39 = vld [vmem:[#allocation9 + $0x120] ss:$8 sps:$4 sm:$0xff]   ;;  %v5210_v43 = vld [vmem:[#allocation9 + $0x90] ss:$8 sps:$4 sm:$0xff]  }
 0x201   :  { %v5636_v44 = vpop.f32.mrf.mxu1  ;;  %3663 = vmatpush1.bf16.msra.mxu0 %v5177_v38  ;;  %v2763_v9 = vadd.f32 %v5603_v32, %v2720_v28  ;;  %v2810_v22 = vadd.f32 %v5614_v48, %v2767_v21  ;;  %v5207_v38 = vld [vmem:[#allocation9 + $0xa0] ss:$8 sps:$4 sm:$0xff]  }
 0x202   :  { %3212 = vmatpush1.bf16.msra.mxu1 %v5174_v37  ;;  %3664 = vmatprep.subr.bf16.mxu0 %v5185_v42  ;;  %v3245_v57 = vmax.f32 %v2937_v49, 0.0  ;;  %v5233_v37 = vld [vmem:[#allocation9 + $0x124] ss:$8 sps:$4 sm:$0xff]   ;;  %v5236_v42 = vld [vmem:[#allocation9 + $0x114] ss:$8 sps:$4 sm:$0xff]  }
 0x203   :  { %v2940_v53 = vpop.f32.mrf.mxu1  ;;  %3213 = vmatprep.subr.bf16.mxu1 %v5182_v40  ;;  %v2806_v10 = vadd.f32 %v5605_v33, %v2763_v9  ;;  %v2853_v47 = vadd.f32 %v5628_v15, %v2810_v22  ;;  %v5212_v40 = vld [vmem:[#allocation9 + $0x94] ss:$8 sps:$4 sm:$0xff]   ;;  %v5215_v49 = vld [vmem:[#allocation9 + $0x84] ss:$8 sps:$4 sm:$0xff]   ;;  %v567_v22 = vsub.s32 3, %v5609_v41 }
 0x204   :  { %v2941_v56 = vadd.f32 %v2940_v53, %v2898_v45  ;;  %v5234_v45 = vld [vmem:[#allocation9 + $0x110] ss:$8 sps:$4 sm:$0xff]   ;;  %v5237_v53 = vld [vmem:[#allocation9 + $0x100] ss:$8 sps:$4 sm:$0xff]  }
 0x205   :  { %3665 = vmatpush1.bf16.msra.mxu0 %v5183_v52  ;;  %v2849_v32 = vadd.f32 %v5621_v60, %v2806_v10  ;;  %v2896_v48 = vadd.f32 %v5630_v17, %v2853_v47  ;;  %v5213_v52 = vld [vmem:[#allocation9 + $0x80] ss:$8 sps:$4 sm:$0xff]   ;;  %v5242_v17 = vld [vmem:[#allocation9 + $0x1f4] ss:$8 sps:$4 sm:$0xff]   ;;  %v568_v47 = vrot.slane %v5616_v51, %v567_v22 }
 0x206   :  { %v3249_v58 = vmax.f32 %v2941_v56, 0.0  ;;  %3214 = vmatpush1.bf16.msra.mxu1 %v5180_v50  ;;  %3666 = vmatprep.subr.bf16.mxu0 %v5191_v55  ;;  %v5239_v50 = vld [vmem:[#allocation9 + $0x104] ss:$8 sps:$4 sm:$0xff]   ;;  %v5272_v20 = vld [vmem:[#allocation12 + $0x58] sm:$0xff]  }
 0x207   :  { %3215 = vmatprep.subr.bf16.mxu1 %v5188_v54  ;;  %v2892_v33 = vadd.f32 %v5623_v61, %v2849_v32  ;;  %v2939_v15 = vadd.f32 %v5636_v44, %v2896_v48  ;;  %v5240_v61 = vld [vmem:[#allocation9 + $0x1f0] ss:$8 sps:$4 sm:$0xff]   ;;  %v5245_v44 = vld [vmem:[#allocation9 + $0x1e4] ss:$8 sps:$4 sm:$0xff]  }
 0x208   :  { %v3253_v63 = vpack.c.bf16 %v3249_v58, %v3245_v57  ;;  %v5243_v57 = vld [vmem:[#allocation9 + $0x1e0] ss:$8 sps:$4 sm:$0xff]   ;;  %v5246_v58 = vld [vmem:[#allocation9 + $0x1d0] ss:$8 sps:$4 sm:$0xff]  }
 0x209   :  { %3667 = vmatpush1.bf16.msra.mxu0 %v5189_v27  ;;  %v2935_v60 = vadd.f32 %v5633_v34, %v2892_v33  ;;  %v3248_v54 = vmax.f32 %v2939_v15, 0.0  ;;  %v5248_v34 = vld [vmem:[#allocation9 + $0x1d4] ss:$8 sps:$4 sm:$0xff]   ;;  %v5251_v27 = vld [vmem:[#allocation9 + $0x1c4] ss:$8 sps:$4 sm:$0xff]  }
 0x20a   :  { %3216 = vmatpush1.bf16.msra.mxu1 %v5186_v59  ;;  %3684 = vmatprep.mubr.bf16.mxu0 %v3253_v63  ;;  %v5249_v59 = vld [vmem:[#allocation9 + $0x1c0] ss:$8 sps:$4 sm:$0xff]   ;;  %v5252_v63 = vld [vmem:[#allocation9 + $0x1b0] ss:$8 sps:$4 sm:$0xff]  }
 0x20b   :  { %3668 = vmatprep.subr.bf16.mxu0 %v5194_v62  ;;  %3695 = vmatprep.subr.bf16.mxu1 %v5218_v0  ;;  %v3244_v55 = vmax.f32 %v2935_v60, 0.0  ;;  %v5254_v62 = vld [vmem:[#allocation9 + $0x1b4] ss:$8 sps:$4 sm:$0xff]   ;;  %v5257_v0 = vld [vmem:[#allocation9 + $0x1a4] ss:$8 sps:$4 sm:$0xff]  }
 0x20c   :  { %v5269_v14 = vld [vmem:[#allocation12 + $0x28] sm:$0xff]  }
 0x20d   :  { %4415 = vmatmul.mubr.msk.bf16.vlgmr.msra.gmra.mxu1 %vm2638_vm0, %v5296_v6  ;;  %3669 = vmatpush2.bf16.msra.mxu0 %v5192_v1  ;;  %v3252_v56 = vpack.c.bf16 %v3248_v54, %v3244_v55  ;;  %v5255_v1 = vld [vmem:[#allocation9 + $0x1a0] ss:$8 sps:$4 sm:$0xff]  }
 0x20e   :  { %3696 = vmatpush1.bf16.msra.mxu1 %v5216_v2  ;;  %3670 = vmatprep.subr.bf16.mxu0 %v5197_v4  ;;  %v5260_v2 = vld [vmem:[#allocation9 + $0x194] ss:$8 sps:$4 sm:$0xff]   ;;  %v5258_v4 = vld [vmem:[#allocation9 + $0x190] ss:$8 sps:$4 sm:$0xff]   ;;  %v5261_v6 = vld [vmem:[#allocation9 + $0x180] ss:$8 sps:$4 sm:$0xff]  }
 0x20f   :  { %3697 = vmatprep.subr.bf16.mxu1 %v5221_v5  ;;  %v5263_v5 = vld [vmem:[#allocation9 + $0x184] ss:$8 sps:$4 sm:$0xff]  }
 0x211   :  { %3671 = vmatpush2.bf16.msra.mxu0 %v5195_v7  ;;  %v5264_v7 = vld [vmem:[#allocation12 + $0x78] sm:$0xff]  }
 0x212   :  { %3698 = vmatpush1.bf16.msra.mxu1 %v5219_v8  ;;  %3672 = vmatprep.subr.bf16.mxu0 %v5200_v12  ;;  %v5265_v8 = vld [vmem:[#allocation12 + $0x38] sm:$0xff]   ;;  %v5267_v12 = vld [vmem:[#allocation12 + $0x30] sm:$0xff]  }
 0x213   :  { %3699 = vmatprep.subr.bf16.mxu1 %v5224_v13  ;;  %v5268_v13 = vld [vmem:[#allocation12 + $0x68] sm:$0xff]  }
 0x215   :  { %3673 = vmatpush2.bf16.msra.mxu0 %v5198_v18  ;;  %v5270_v18 = vld [vmem:[#allocation12 + $0x60] sm:$0xff]  }
 0x216   :  { %3700 = vmatpush1.bf16.msra.mxu1 %v5222_v19  ;;  %3674 = vmatprep.subr.bf16.mxu0 %v5203_v23  ;;  %v5271_v19 = vld [vmem:[#allocation12 + $0x20] sm:$0xff]   ;;  %v5273_v23 = vld [vmem:[#allocation12 + $0x18] sm:$0xff]  }
 0x217   :  { %3701 = vmatprep.subr.bf16.mxu1 %v5227_v16 }
 0x219   :  { %3675 = vmatpush2.bf16.msra.mxu0 %v5201_v25 }
 0x21a   :  { %3702 = vmatpush1.bf16.msra.mxu1 %v5225_v26  ;;  %3676 = vmatprep.subr.bf16.mxu0 %v5206_v29 }
 0x21b   :  { %3703 = vmatprep.subr.bf16.mxu1 %v5230_v30 }
 0x21d   :  { %3677 = vmatpush2.bf16.msra.mxu0 %v5204_v31 }
 0x21e   :  { %3704 = vmatpush1.bf16.msra.mxu1 %v5228_v35  ;;  %3678 = vmatprep.subr.bf16.mxu0 %v5209_v36  ;;  %v563_v36 = vsub.s32 2, %v5609_v41 }
 0x21f   :  { %3705 = vmatprep.subr.bf16.mxu1 %v5233_v37 }
 0x221   :  { %3679 = vmatpush2.bf16.msra.mxu0 %v5207_v38  ;;  %v564_v38 = vrot.slane %v5616_v51, %v563_v36 }
 0x222   :  { %3706 = vmatpush1.bf16.msra.mxu1 %v5231_v39  ;;  %3680 = vmatprep.subr.bf16.mxu0 %v5212_v40 }
 0x223   :  { %3707 = vmatprep.subr.bf16.mxu1 %v5236_v42 }
 0x225   :  { %3681 = vmatpush2.bf16.msra.mxu0 %v5210_v43 }
 0x226   :  { %3708 = vmatpush1.bf16.msra.mxu1 %v5234_v45  ;;  %3682 = vmatprep.subr.bf16.mxu0 %v5215_v49 }
 0x227   :  { %3709 = vmatprep.subr.bf16.mxu1 %v5239_v50 }
 0x229   :  { %3683 = vmatpush2.bf16.msra.mxu0 %v5213_v52 }
 0x22a   :  { %3710 = vmatpush1.bf16.msra.mxu1 %v5237_v53  ;;  %4498 = vmatprep.subr.bf16.mxu0 %v5264_v7 }
 0x22b   :  { %3711 = vmatprep.subr.bf16.mxu1 %v5242_v17 }
 0x22c   :  { %3685 = vmatmul.mubr.bf16.vlgmr.msra.gmra.mxu0 %v3252_v56  ;;  %v3020_v25 = vpop.f32.mrf.mxu0 }
 0x22d   :  { %4499 = vmatpush3.bf16.msra.mxu0 %v5265_v8 }
 0x22e   :  { %3712 = vmatpush2.bf16.msra.mxu1 %v5240_v61  ;;  %4500 = vmatprep.subr.bf16.mxu0 %v5266_v11  ;;  %v3022_v28 = vpop.f32.mrf.mxu0 }
 0x22f   :  { %3713 = vmatprep.subr.bf16.mxu1 %v5245_v44 }
 0x230   :  { %v3024_v29 = vpop.f32.mrf.mxu0 }
 0x231   :  { %4501 = vmatpush3.bf16.msra.mxu0 %v5267_v12 }
 0x232   :  { %3714 = vmatpush2.bf16.msra.mxu1 %v5243_v57  ;;  %4502 = vmatprep.subr.bf16.mxu0 %v5268_v13  ;;  %v3026_v9 = vpop.f32.mrf.mxu0 }
 0x233   :  { %3715 = vmatprep.subr.bf16.mxu1 %v5248_v34 }
 0x235   :  { %4503 = vmatpush3.bf16.msra.mxu0 %v5269_v14 }
 0x236   :  { %3716 = vmatpush2.bf16.msra.mxu1 %v5246_v58  ;;  %4504 = vmatprep.subr.bf16.mxu0 %v5270_v18 }
 0x237   :  { %3717 = vmatprep.subr.bf16.mxu1 %v5251_v27 }
 0x239   :  { %4505 = vmatpush3.bf16.msra.mxu0 %v5271_v19 }
 0x23a   :  { %3718 = vmatpush2.bf16.msra.mxu1 %v5249_v59  ;;  %4506 = vmatprep.subr.bf16.mxu0 %v5272_v20 }
 0x23b   :  { %3719 = vmatprep.subr.bf16.mxu1 %v5254_v62 }
 0x23d   :  { %4507 = vmatpush3.bf16.msra.mxu0 %v5273_v23  ;;  %v2977_v16 = vpop.f32.mrf.mxu1 }
 0x23e   :  { %3720 = vmatpush2.bf16.msra.mxu1 %v5252_v63  ;;  %v2978_v43 = vadd.f32 %v2977_v16, %v564_v38 }
 0x23f   :  { %3721 = vmatprep.subr.bf16.mxu1 %v5257_v0  ;;  %v2979_v24 = vpop.f32.mrf.mxu1 }
 0x240   :  { %v2980_v42 = vadd.f32 %v2979_v24, %v568_v47  ;;  %v3021_v52 = vadd.f32 %v3020_v25, %v2978_v43 }
 0x241   :  { %v2981_v26 = vpop.f32.mrf.mxu1 }
 0x242   :  { %3722 = vmatpush2.bf16.msra.mxu1 %v5255_v1  ;;  %v2982_v48 = vadd.f32 %v2981_v26, %v564_v38  ;;  %v3023_v50 = vadd.f32 %v3022_v28, %v2980_v42 }
 0x243   :  { %3723 = vmatprep.subr.bf16.mxu1 %v5260_v2  ;;  %v2983_v21 = vpop.f32.mrf.mxu1 }
 0x244   :  { %v2984_v33 = vadd.f32 %v2983_v21, %v568_v47  ;;  %v3025_v60 = vadd.f32 %v3024_v29, %v2982_v48  ;;  %v5274_v21 = vld [vmem:[#allocation12 + $0x50] sm:$0xff]  }
 0x245   :  { %v5275_v29 = vld [vmem:[#allocation12 + $0x10] sm:$0xff]   ;;  %4508 = vmatprep.subr.bf16.mxu0 %v5274_v21 }
 0x246   :  { %3724 = vmatpush2.bf16.msra.mxu1 %v5258_v4  ;;  %v3027_v53 = vadd.f32 %v3026_v9, %v2984_v33  ;;  %4509 = vmatpush3.bf16.msra.mxu0 %v5275_v29  ;;  %v5277_v9 = vld [vmem:[#allocation12 + $0x8] sm:$0xff]  }
 0x247   :  { %3725 = vmatprep.subr.bf16.mxu1 %v5263_v5 }
 0x24a   :  { %3726 = vmatpush2.bf16.msra.mxu1 %v5261_v6 }
 0x26c   :  { %v3106_v35 = vpop.f32.mrf.mxu0 }
 0x26e   :  { %v3108_v10 = vpop.f32.mrf.mxu0 }
 0x270   :  { %v3110_v32 = vpop.f32.mrf.mxu0 }
 0x272   :  { %v3112_v45 = vpop.f32.mrf.mxu0 }
 0x27d   :  { %v3063_v30 = vpop.f32.mrf.mxu1 }
 0x27e   :  { %v3064_v55 = vadd.f32 %v3063_v30, %v3021_v52  ;;  %v5276_v30 = vld [vmem:[#allocation12 + $0x48] sm:$0xff]  }
 0x27f   :  { %v3065_v31 = vpop.f32.mrf.mxu1  ;;  %4510 = vmatprep.subr.bf16.mxu0 %v5276_v30 }
 0x280   :  { %v3066_v54 = vadd.f32 %v3065_v31, %v3023_v50  ;;  %v3107_v34 = vadd.f32 %v3106_v35, %v3064_v55  ;;  %4511 = vmatpush3.bf16.msra.mxu0 %v5277_v9  ;;  %v5278_v31 = vld [vmem:[#allocation12 + $0x40] sm:$0xff]  }
 0x281   :  { %v3067_v37 = vpop.f32.mrf.mxu1  ;;  %v5279_v35 = vld [vmem:[#allocation12] sm:$0xff]   ;;  %4512 = vmatprep.subr.bf16.mxu0 %v5278_v31 }
 0x282   :  { %v3068_v17 = vadd.f32 %v3067_v37, %v3025_v60  ;;  %v3109_v44 = vadd.f32 %v3108_v10, %v3066_v54  ;;  %v3320_v37 = vld [vmem:[#allocation11] sm:$0x3] }
 0x283   :  { %v3069_v39 = vpop.f32.mrf.mxu1  ;;  %v3329_v47 = vrot.slane %v3320_v37, %v559_v46  ;;  %v3325_v38 = vrot.slane %v3320_v37, %v5639_v3 }
 0x284   :  { %v3070_v51 = vadd.f32 %v3069_v39, %v3027_v53  ;;  %v3111_v57 = vadd.f32 %v3110_v32, %v3068_v17  ;;  %4513 = vmatpush3.bf16.msra.mxu0 %v5279_v35 }
 0x286   :  { %v3113_v27 = vadd.f32 %v3112_v45, %v3070_v51 }
 0x2ac   :  { %v3192_v49 = vpop.f32.mrf.mxu0 }
 0x2ae   :  { %v3194_v56 = vpop.f32.mrf.mxu0 }
 0x2b0   :  { %v3196_v59 = vpop.f32.mrf.mxu0 }
 0x2b2   :  { %v3198_v4 = vpop.f32.mrf.mxu0 }
 0x2bd   :  { %v3149_v40 = vpop.f32.mrf.mxu1 }
 0x2be   :  { %v3150_v0 = vadd.f32 %v3149_v40, %v3107_v34  ;;  %v4480_v34 = vld [vmem:[#allocation14] ss:$0 sm:$0xff] }
 0x2bf   :  { %v3151_v15 = vpop.f32.mrf.mxu1 }
 0x2c0   :  { %v3152_v62 = vadd.f32 %v3151_v15, %v3109_v44  ;;  %v3193_v8 = vadd.f32 %v3192_v49, %v3150_v0 }
 0x2c1   :  { %v3153_v61 = vpop.f32.mrf.mxu1 }
 0x2c2   :  { %v3154_v63 = vadd.f32 %v3153_v61, %v3111_v57  ;;  %v3195_v6 = vadd.f32 %v3194_v56, %v3152_v62  ;;  %v5506_v61 = vmov 0.0   ;;  %v3924_v56 = vld [vmem:[#allocation2] sm:$0x1] }
 0x2c3   :  { %v3155_v58 = vpop.f32.mrf.mxu1  ;;  %4522 = vmatprep.subr.bf16.mxu1 %v5506_v61  ;;  %3927 = vperm.xlu0 %4548, %v3924_v56  }
 0x2c4   :  { %v3156_v2 = vadd.f32 %v3155_v58, %v3113_v27  ;;  %v3197_v7 = vadd.f32 %v3196_v59, %v3154_v63 }
 0x2c6   :  { %v3199_v12 = vadd.f32 %v3198_v4, %v3156_v2  ;;  %v3922_v4 = vld [vmem:[#allocation15] sm:$0x1] }
 0x2cd   :  { %v3235_v1 = vpop.f32.mrf.mxu1 }
 0x2ce   :  { %v3236_v18 = vadd.f32 %v3235_v1, %v3193_v8 }
 0x2cf   :  { %v3237_v5 = vpop.f32.mrf.mxu1 }
 0x2d0   :  { %v3238_v13 = vadd.f32 %v3237_v5, %v3195_v6  ;;  %v3246_v25 = vmax.f32 %v3236_v18, 0.0 }
 0x2d1   :  { %v3239_v11 = vpop.f32.mrf.mxu1 }
 0x2d2   :  { %v3240_v14 = vadd.f32 %v3239_v11, %v3197_v7  ;;  %v3247_v16 = vmax.f32 %v3238_v13, 0.0 }
 0x2d3   :  { %v3241_v19 = vpop.f32.mrf.mxu1 }
 0x2d4   :  { %v3242_v20 = vadd.f32 %v3241_v19, %v3199_v12  ;;  %v3250_v23 = vmax.f32 %v3240_v14, 0.0 }
 0x2d6   :  { %v3251_v24 = vmax.f32 %v3242_v20, 0.0  ;;  %v3254_v28 = vpack.c.bf16 %v3250_v23, %v3246_v25 }
 0x2d8   :  { %v3255_v26 = vpack.c.bf16 %v3251_v24, %v3247_v16 }
 0x2da   :  { %3727 = vmatprep.mubr.bf16.mxu1 %v3255_v26 }
 0x2db   :  { %3728 = vmatmul.mubr.bf16.vlgmr.msra.gmra.mxu1 %v3254_v28 }
 0x2dc   :  { %4524 = vmatprep.mubr.msk.bf16.mxu1 %vm5507_vm1, %v5506_v61 }
 0x2ec   :  { %v3686_v22 = vpop.f32.mrf.mxu0 }
 0x2ed   :  { %v3687_v43 = vadd.f32 %v3686_v22, %v3325_v38 }
 0x2ee   :  { %v3688_v36 = vpop.f32.mrf.mxu0 }
 0x2ef   :  { %v3689_v42 = vadd.f32 %v3688_v36, %v3329_v47 }
 0x2f0   :  { %v3690_v10 = vpop.f32.mrf.mxu0 }
 0x2f1   :  { %v3691_v48 = vadd.f32 %v3690_v10, %v3325_v38 }
 0x2f2   :  { %v3692_v32 = vpop.f32.mrf.mxu0 }
 0x2f3   :  { %v3693_v33 = vadd.f32 %v3692_v32, %v3329_v47 }
 0x33e   :  { %v3928_v5 = vpop.permute.xlu0 %3927 }
 0x33f   :  { %v3933_v6 = vrot.slane %v3928_v5, %v5639_v3 }
 0x39b   :  { %v3729_v39 = vpop.f32.mrf.mxu1 }
 0x39c   :  { %v3730_v50 = vadd.f32 %v3729_v39, %v3687_v43 }
 0x39d   :  { %v3731_v40 = vpop.f32.mrf.mxu1 }
 0x39e   :  { %v3732_v15 = vadd.f32 %v3731_v40, %v3689_v42  ;;  %v3738_v41 = vmax.f32 %v3730_v50, 0.0 }
 0x39f   :  { %v3733_v45 = vpop.f32.mrf.mxu1 }
 0x3a0   :  { %v3734_v49 = vadd.f32 %v3733_v45, %v3691_v48  ;;  %v3739_v54 = vmax.f32 %v3732_v15, 0.0 }
 0x3a1   :  { %v3735_v60 = vpop.f32.mrf.mxu1 }
 0x3a2   :  { %v3736_v52 = vadd.f32 %v3735_v60, %v3693_v33  ;;  %v3740_v53 = vmax.f32 %v3734_v49, 0.0 }
 0x3a4   :  { %v3741_v17 = vmax.f32 %v3736_v52, 0.0  ;;  %v3742_v55 = vpack.c.bf16 %v3740_v53, %v3738_v41 }
 0x3a6   :  { %v3743_v46 = vpack.c.bf16 %v3741_v17, %v3739_v54 }
 0x3a8   :  { %3911 = vmatprep.mubr.bf16.mxu0 %v3743_v46 }
 0x3a9   :  { %3912 = vmatmul.mubr.bf16.vlgmr.msra.gmra.mxu0 %v3742_v55 }
 0x469   :  { %v4514_v51 = vpop.f32.mrf.mxu0 }
 0x46b   :  { %v4515_v44 = vpop.f32.mrf.mxu0 }
 0x46c   :  { %v4516_v57 = vadd.f32 %v4515_v44, %v4514_v51 }
 0x46d   :  { %v4517_v58 = vpop.f32.mrf.mxu0 }
 0x46e   :  { %v3914_v27 = vadd.f32 %v4516_v57, %v4480_v34 }
 0x46f   :  { %v4518_v59 = vpop.f32.mrf.mxu0 }
 0x470   :  { %v4519_v62 = vadd.f32 %v4518_v59, %v4517_v58  ;;  %v3920_v0 = vmax.f32 %v3914_v27, 0.0 }
 0x472   :  { %v3917_v63 = vadd.f32 %v4519_v62, %v4480_v34 }
 0x474   :  { %v3921_v1 = vmax.f32 %v3917_v63, 0.0 }
 0x476   :  { %v3923_v2 = vpack.c.bf16 %v3921_v1, %v3920_v0 }
 0x478   :  { %4523 = vmatpush3.bf16.xpose.msra.mxu1 %v3923_v2 }
 0x47f   :  { %4525 = vmatmul.mubr.bf16.vlgmr.msra.gmra.mxu1 %v3922_v4 }
 0x53f   :  { %v3968_v7 = vpop.f32.mrf.mxu1 }
 0x540   :  { %v3969_v8 = vadd.f32 %v3968_v7, %v3933_v6 }
 0x541   :  { %v4526_v11 = vpop.f32.mrf.mxu1 }
 0x542   :  { %v4497_v12 = vmul.f32 -1.442695, %v3969_v8 }
 0x543   :  { %v3971_v13 = vpop.f32.mrf.mxu1 }
 0x544   :  { %5280 = vpow2.f32 %v4497_v12 }
 0x545   :  { %v4527_v14 = vpop.f32.mrf.mxu1 }
 0x551   :  { %v5281_v18 = vpop.eup %5280 }
 0x552   :  { %v3977_v19 = vadd.f32 1.0, %v5281_v18 }
 0x554   :  { %5282 = vrcp.f32 %v3977_v19 }
 0x561   :  { %v5283_v20 = vpop.eup %5282 }
 0x562   :  { %3981 = vst.msk [vmem:[#allocation17] sm:$0x1] %vm3980_vm2, %v5283_v20 }
 0x563   :  { %5468 = shalt.err (!%p5465_p2)
}
 0x564   :  { %3991 = dma.vmem_to_hbm [thread:$0]  %s3989_s7, 16, %s5678_s9, [#allocation5]  }
 0x565   :  { %5487 = dma.done.wait [#allocation5], 16  }
 0x566   :  { %5488 = vsyncadd [#allocation5], 4294967280 }
 0x567   :  { %3995 = vsyncpa [#allocation4], 1 }
 0x568   :  { %3996 = vsyncpa [#allocation7], 1 }
 0x569   :  { %3997 = vsyncpa [#allocation10], 1 }
 0x56a   :  { %3998 = vsyncpa [#allocation13], 1 }
 0x56b   :  { %3999 = vsyncpa [#allocation16], 1 }
 0x56c   :  { %4000 = vsyncpa [#allocation5], 1 }

</bundles_post_ra>
